<compile_context>
chip_gen: v6e
topology: v6e:2x2x1
jax: 0.10.0
libtpu: 0.0.40
codegen_flags: <defaults>
</compile_context>

<pallas_src>
import functools

import jax
import jax.numpy as jnp
from jax.experimental import pallas as pl
from jax.experimental.pallas import tpu as pltpu


def _pixel_shuffle_kernel(x_ref, p_ref, o_ref, *, s1, s2, d_blk, H, precision):
    # x_ref: (s1*s2, d_blk*H, W)    sub-channels for this (b, n, a, depth tile)
    # p_ref: (s2, W, s2*W)          constant 0/1 interleave blocks (VMEM-resident)
    # o_ref: (d_blk, 1, H, s1*s2*W) lane-flat output slab for this (b, n, a, tile)
    w2 = p_ref.shape[-1]                        # = s2 * W
    for j in range(s1):
        acc = None
        for k in range(s2):
            contrib = jnp.dot(x_ref[j * s2 + k].astype(p_ref.dtype), p_ref[k],
                              preferred_element_type=jnp.float32,
                              precision=precision)
            acc = contrib if acc is None else acc + contrib
        o_ref[:, :, :, j * w2:(j + 1) * w2] = (
            acc.reshape(d_blk, 1, H, w2).astype(o_ref.dtype))


def _vmem_budget():
    """Return (block budget bytes, vmem_limit_bytes), sized per TPU generation."""
    try:
        cap = int(pltpu.get_tpu_info().vmem_capacity_bytes)
    except Exception:
        cap = 64 << 20                          # conservative (v7x-sized) fallback
    limit = min(cap - (16 << 20), int(cap * 0.80))
    limit = min(max(limit, 24 << 20), cap)
    return limit - (6 << 20), limit


def _pick_depth_tile(D, H, W, scale, itemsize, budget_bytes, other_steps):
    """Largest divisor of D whose lane-padded, double-buffered in/out blocks (plus
    resident P and the f32 accumulator) fit the VMEM budget, subject to sublane
    layout legality, keeping >= 2 total grid steps so both v7x cores get work."""
    s0, s1, s2 = scale
    n_sub = s1 * s2
    M = n_sub * W
    rup = lambda n, m: -(-n // m) * m
    sub = {4: 8, 2: 16, 1: 32}.get(itemsize, 8)
    per_depth = (2 * n_sub * H * rup(W, 128) * itemsize          # input block  (x2 buffers)
                 + 2 * rup(H, sub) * rup(M, 128) * itemsize      # output block (x2 buffers)
                 + 2 * H * rup(s2 * W, 128) * 4)                 # f32 accumulator slack
    fixed = 2 * s2 * rup(W, 8) * rup(s2 * W, 128) * 4            # resident P (allow 2 copies)
    legal = [c for c in range(1, D + 1)
             if D % c == 0 and (c == D or (c * H) % sub == 0)]
    fit = [c for c in legal if fixed + c * per_depth <= budget_bytes]
    c = max(fit) if fit else min(legal)
    if other_steps * (D // c) < 2:                               # keep both v7x TCs busy
        smaller = [cc for cc in legal
                   if D // cc >= 2 and fixed + cc * per_depth <= budget_bytes]
        if smaller:
            c = max(smaller)
    return c


def pixel_shuffle_3d(x, upscale_factor):
    """Exact equivalent of the PyTorch PixelShuffle3D.forward (NCDHW layout)."""
    if isinstance(upscale_factor, int):
        upscale_factor = (upscale_factor,) * 3
    s0, s1, s2 = (int(s) for s in upscale_factor)
    B, C, D, H, W = x.shape
    n_sub = s1 * s2
    prod = s0 * n_sub
    assert C % prod == 0, "channels must be divisible by prod(upscale_factor)"
    n_out = C // prod
    M = n_sub * W                                # lane-flat output width per (d, h) row
    W2 = s2 * W

    # Kronecker factor of the lane permutation (Q = I_{s1} (x) P): P[k, w, w*s2+k] = 1.
    # 0/1 matrix + f32 accumulate -> exact permutation for float dtypes.
    p_dtype = jnp.bfloat16 if x.dtype == jnp.bfloat16 else jnp.float32
    tgt = jnp.arange(W)[None, :] * s2 + jnp.arange(s2)[:, None]          # (s2, W)
    p = (tgt[:, :, None] == jnp.arange(W2)[None, None, :]).astype(p_dtype)
    precision = (jax.lax.Precision.HIGHEST if p_dtype == jnp.float32
                 else jax.lax.Precision.DEFAULT)

    # Free, contiguous views only (channel split + depth/height merge).
    x_v = x.reshape(B, n_out, s0, n_sub, D * H, W)

    itemsize = jnp.dtype(x.dtype).itemsize
    budget, vmem_limit = _vmem_budget()
    d_blk = _pick_depth_tile(D, H, W, (s0, s1, s2), itemsize, budget,
                             other_steps=B * n_out * s0)
    grid = (B, n_out, s0, D // d_blk)

    def build(single_buffer_p, prec):
        kernel = functools.partial(_pixel_shuffle_kernel, s1=s1, s2=s2,
                                   d_blk=d_blk, H=H, precision=prec)
        if single_buffer_p:
            p_spec = pl.BlockSpec((s2, W, W2), lambda b, n, a, d: (0, 0, 0),
                                  pipeline_mode=pl.Buffered(1))
        else:
            p_spec = pl.BlockSpec((s2, W, W2), lambda b, n, a, d: (0, 0, 0))
        return pl.pallas_call(
            kernel,
            out_shape=jax.ShapeDtypeStruct((B, n_out, D, s0, H, M), x.dtype),
            grid=grid,
            in_specs=[
                pl.BlockSpec((None, None, None, n_sub, d_blk * H, W),
                             lambda b, n, a, d: (b, n, a, 0, d, 0)),
                p_spec,                                   # constant -> VMEM resident
            ],
            out_specs=pl.BlockSpec((None, None, d_blk, 1, H, M),
                                   lambda b, n, a, d: (b, n, d, a, 0, 0)),
            compiler_params=pltpu.CompilerParams(
                dimension_semantics=("parallel",) * 4,
                vmem_limit_bytes=vmem_limit),
        )

    attempts = ((True, precision), (False, precision),
                (False, jax.lax.Precision.DEFAULT))
    last_err = None
    out_view = None
    for single_buf, prec in attempts:
        try:
            out_view = build(single_buf, prec)(x_v, p)
            break
        except Exception as e:                   # lowering fallback (Buffered/precision)
            last_err = e
    if out_view is None:
        raise last_err

    # Free contiguous reshape of the (D, s0, H, s1*s2*W) view back to real layout.
    return out_view.reshape(B, n_out, D * s0, H * s1, W * s2)


def _reference(x, scale):
    # Pure-JAX mirror of the PyTorch view/permute/view.
    s0, s1, s2 = scale
    B, C, D, H, W = x.shape
    n_out = C // (s0 * s1 * s2)
    v = x.reshape(B, n_out, s0, s1, s2, D, H, W)
    v = jnp.transpose(v, (0, 1, 5, 2, 6, 3, 7, 4))
    return v.reshape(B, n_out, D * s0, H * s1, W * s2)


if __name__ == "__main__":
    key = jax.random.PRNGKey(0)

    # Case 1: cubic upscale 2 -> C must be divisible by 8.
    B, C, D, H, W = 2, 16, 4, 8, 8
    x1 = jax.random.normal(key, (B, C, D, H, W), dtype=jnp.float32)
    out1 = jax.block_until_ready(pixel_shuffle_3d(x1, 2))
    ref1 = _reference(x1, (2, 2, 2))
    assert out1.shape == ref1.shape == (B, C // 8, D * 2, H * 2, W * 2)
    assert out1.dtype == ref1.dtype
    assert bool(jnp.allclose(out1, ref1)), "PixelShuffle3D kernel mismatch (case 1)"

    # Case 2: anisotropic upscale (1, 2, 2).
    key2 = jax.random.fold_in(key, 1)
    x2 = jax.random.normal(key2, (2, 8, 3, 8, 8), dtype=jnp.float32)
    out2 = jax.block_until_ready(pixel_shuffle_3d(x2, (1, 2, 2)))
    ref2 = _reference(x2, (1, 2, 2))
    assert out2.shape == ref2.shape and out2.dtype == ref2.dtype
    assert bool(jnp.allclose(out2, ref2)), "PixelShuffle3D kernel mismatch (case 2)"

    print("KERNEL_OK")
</pallas_src>

<mosaic_0001>
module attributes {stable_mosaic.version = 11 : i64} {
  func.func @_pixel_shuffle_kernel(%arg0: i32, %arg1: i32, %arg2: i32, %arg3: i32, %arg4: memref<1x1x1x4x32x8xf32, #tpu.memory_space<vmem>>, %arg5: memref<2x8x16xf32, #tpu.memory_space<vmem>>, %arg6: memref<1x1x4x1x8x32xf32, #tpu.memory_space<vmem>>) attributes {dimension_semantics = [#tpu.dimension_semantics<parallel>, #tpu.dimension_semantics<parallel>, #tpu.dimension_semantics<parallel>, #tpu.dimension_semantics<parallel>], iteration_bounds = array<i64: 2, 2, 2, 1>, scalar_prefetch = 0 : i64, scratch_operands = 0 : i64, tpu.core_type = #tpu.core_type<tc>, window_params = [{transform_indices = @transform_0, window_bounds = array<i64: 1, 1, 1, 4, 32, 8>}, {pipeline_mode = #tpu.pipeline_mode<synchronous>, transform_indices = @transform_1, window_bounds = array<i64: 2, 8, 16>}, {transform_indices = @transform_2, window_bounds = array<i64: 1, 1, 4, 1, 8, 32>}]} {
    %c0 = arith.constant 0 : index
    %c0_0 = arith.constant 0 : index
    %c0_1 = arith.constant 0 : index
    %c0_2 = arith.constant 0 : index
    %c0_3 = arith.constant 0 : index
    %c0_4 = arith.constant 0 : index
    %0 = vector.load %arg4[%c0, %c0_0, %c0_1, %c0_2, %c0_3, %c0_4] : memref<1x1x1x4x32x8xf32, #tpu.memory_space<vmem>>, vector<1x1x1x1x32x8xf32>
    %1 = vector.shape_cast %0 : vector<1x1x1x1x32x8xf32> to vector<32x8xf32>
    %c0_5 = arith.constant 0 : index
    %c0_6 = arith.constant 0 : index
    %c0_7 = arith.constant 0 : index
    %2 = vector.load %arg5[%c0_5, %c0_6, %c0_7] : memref<2x8x16xf32, #tpu.memory_space<vmem>>, vector<1x8x16xf32>
    %3 = vector.shape_cast %2 : vector<1x8x16xf32> to vector<8x16xf32>
    %cst = arith.constant dense<0.000000e+00> : vector<32x16xf32>
    %4 = tpu.matmul %1, %3, %cst {dimension_numbers = #tpu.dot_dimension_numbers<[1], [0], [0], [1], [0, 0, 1, 1], [], []>, precision = #tpu.contract_precision<fp32>} : vector<32x8xf32>, vector<8x16xf32>, vector<32x16xf32> -> vector<32x16xf32>
    %c0_8 = arith.constant 0 : index
    %c0_9 = arith.constant 0 : index
    %c0_10 = arith.constant 0 : index
    %c1 = arith.constant 1 : index
    %c0_11 = arith.constant 0 : index
    %c0_12 = arith.constant 0 : index
    %5 = vector.load %arg4[%c0_8, %c0_9, %c0_10, %c1, %c0_11, %c0_12] : memref<1x1x1x4x32x8xf32, #tpu.memory_space<vmem>>, vector<1x1x1x1x32x8xf32>
    %6 = vector.shape_cast %5 : vector<1x1x1x1x32x8xf32> to vector<32x8xf32>
    %c1_13 = arith.constant 1 : index
    %c0_14 = arith.constant 0 : index
    %c0_15 = arith.constant 0 : index
    %7 = vector.load %arg5[%c1_13, %c0_14, %c0_15] : memref<2x8x16xf32, #tpu.memory_space<vmem>>, vector<1x8x16xf32>
    %8 = vector.shape_cast %7 : vector<1x8x16xf32> to vector<8x16xf32>
    %cst_16 = arith.constant dense<0.000000e+00> : vector<32x16xf32>
    %9 = tpu.matmul %6, %8, %cst_16 {dimension_numbers = #tpu.dot_dimension_numbers<[1], [0], [0], [1], [0, 0, 1, 1], [], []>, precision = #tpu.contract_precision<fp32>} : vector<32x8xf32>, vector<8x16xf32>, vector<32x16xf32> -> vector<32x16xf32>
    %10 = arith.addf %4, %9 : vector<32x16xf32>
    %11 = vector.shape_cast %10 : vector<32x16xf32> to vector<4x1x8x16xf32>
    %c0_17 = arith.constant 0 : index
    %c0_18 = arith.constant 0 : index
    %c0_19 = arith.constant 0 : index
    %c0_20 = arith.constant 0 : index
    %c0_21 = arith.constant 0 : index
    %c0_22 = arith.constant 0 : index
    %12 = vector.load %arg6[%c0_17, %c0_18, %c0_19, %c0_20, %c0_21, %c0_22] : memref<1x1x4x1x8x32xf32, #tpu.memory_space<vmem>>, vector<1x1x4x1x8x16xf32>
    %13 = vector.shape_cast %12 : vector<1x1x4x1x8x16xf32> to vector<4x1x8x16xf32>
    %14 = vector.shape_cast %11 : vector<4x1x8x16xf32> to vector<1x1x4x1x8x16xf32>
    tpu.vector_store %arg6[%c0_17, %c0_18, %c0_19, %c0_20, %c0_21, %c0_22], %14 {strides = array<i32>} : memref<1x1x4x1x8x32xf32, #tpu.memory_space<vmem>>, vector<1x1x4x1x8x16xf32>,
    %c0_23 = arith.constant 0 : index
    %c0_24 = arith.constant 0 : index
    %c0_25 = arith.constant 0 : index
    %c2 = arith.constant 2 : index
    %c0_26 = arith.constant 0 : index
    %c0_27 = arith.constant 0 : index
    %15 = vector.load %arg4[%c0_23, %c0_24, %c0_25, %c2, %c0_26, %c0_27] : memref<1x1x1x4x32x8xf32, #tpu.memory_space<vmem>>, vector<1x1x1x1x32x8xf32>
    %16 = vector.shape_cast %15 : vector<1x1x1x1x32x8xf32> to vector<32x8xf32>
    %c0_28 = arith.constant 0 : index
    %c0_29 = arith.constant 0 : index
    %c0_30 = arith.constant 0 : index
    %17 = vector.load %arg5[%c0_28, %c0_29, %c0_30] : memref<2x8x16xf32, #tpu.memory_space<vmem>>, vector<1x8x16xf32>
    %18 = vector.shape_cast %17 : vector<1x8x16xf32> to vector<8x16xf32>
    %cst_31 = arith.constant dense<0.000000e+00> : vector<32x16xf32>
    %19 = tpu.matmul %16, %18, %cst_31 {dimension_numbers = #tpu.dot_dimension_numbers<[1], [0], [0], [1], [0, 0, 1, 1], [], []>, precision = #tpu.contract_precision<fp32>} : vector<32x8xf32>, vector<8x16xf32>, vector<32x16xf32> -> vector<32x16xf32>
    %c0_32 = arith.constant 0 : index
    %c0_33 = arith.constant 0 : index
    %c0_34 = arith.constant 0 : index
    %c3 = arith.constant 3 : index
    %c0_35 = arith.constant 0 : index
    %c0_36 = arith.constant 0 : index
    %20 = vector.load %arg4[%c0_32, %c0_33, %c0_34, %c3, %c0_35, %c0_36] : memref<1x1x1x4x32x8xf32, #tpu.memory_space<vmem>>, vector<1x1x1x1x32x8xf32>
    %21 = vector.shape_cast %20 : vector<1x1x1x1x32x8xf32> to vector<32x8xf32>
    %c1_37 = arith.constant 1 : index
    %c0_38 = arith.constant 0 : index
    %c0_39 = arith.constant 0 : index
    %22 = vector.load %arg5[%c1_37, %c0_38, %c0_39] : memref<2x8x16xf32, #tpu.memory_space<vmem>>, vector<1x8x16xf32>
    %23 = vector.shape_cast %22 : vector<1x8x16xf32> to vector<8x16xf32>
    %cst_40 = arith.constant dense<0.000000e+00> : vector<32x16xf32>
    %24 = tpu.matmul %21, %23, %cst_40 {dimension_numbers = #tpu.dot_dimension_numbers<[1], [0], [0], [1], [0, 0, 1, 1], [], []>, precision = #tpu.contract_precision<fp32>} : vector<32x8xf32>, vector<8x16xf32>, vector<32x16xf32> -> vector<32x16xf32>
    %25 = arith.addf %19, %24 : vector<32x16xf32>
    %26 = vector.shape_cast %25 : vector<32x16xf32> to vector<4x1x8x16xf32>
    %c0_41 = arith.constant 0 : index
    %c0_42 = arith.constant 0 : index
    %c0_43 = arith.constant 0 : index
    %c0_44 = arith.constant 0 : index
    %c0_45 = arith.constant 0 : index
    %c16 = arith.constant 16 : index
    %27 = vector.load %arg6[%c0_41, %c0_42, %c0_43, %c0_44, %c0_45, %c16] : memref<1x1x4x1x8x32xf32, #tpu.memory_space<vmem>>, vector<1x1x4x1x8x16xf32>
    %28 = vector.shape_cast %27 : vector<1x1x4x1x8x16xf32> to vector<4x1x8x16xf32>
    %29 = vector.shape_cast %26 : vector<4x1x8x16xf32> to vector<1x1x4x1x8x16xf32>
    tpu.vector_store %arg6[%c0_41, %c0_42, %c0_43, %c0_44, %c0_45, %c16], %29 {strides = array<i32>} : memref<1x1x4x1x8x32xf32, #tpu.memory_space<vmem>>, vector<1x1x4x1x8x16xf32>,
    return
  }
  func.func @transform_0(%arg0: i32, %arg1: i32, %arg2: i32, %arg3: i32) -> (i32, i32, i32, i32, i32, i32) {
    %c0_i32 = arith.constant 0 : i32
    %c0_i32_0 = arith.constant 0 : i32
    %c0_i32_1 = arith.constant 0 : i32
    return %arg0, %arg1, %arg2, %c0_i32, %arg3, %c0_i32_0 : i32, i32, i32, i32, i32, i32
  }
  func.func @transform_1(%arg0: i32, %arg1: i32, %arg2: i32, %arg3: i32) -> (i32, i32, i32) {
    %c0_i32 = arith.constant 0 : i32
    %c0_i32_0 = arith.constant 0 : i32
    %c0_i32_1 = arith.constant 0 : i32
    %c0_i32_2 = arith.constant 0 : i32
    return %c0_i32, %c0_i32_0, %c0_i32_1 : i32, i32, i32
  }
  func.func @transform_2(%arg0: i32, %arg1: i32, %arg2: i32, %arg3: i32) -> (i32, i32, i32, i32, i32, i32) {
    %c0_i32 = arith.constant 0 : i32
    %c0_i32_0 = arith.constant 0 : i32
    %c0_i32_1 = arith.constant 0 : i32
    return %arg0, %arg1, %arg3, %arg2, %c0_i32, %c0_i32_0 : i32, i32, i32, i32, i32, i32
  }
}

module attributes {stable_mosaic.version = 11 : i64} {
  func.func @_pixel_shuffle_kernel(%arg0: i32, %arg1: i32, %arg2: i32, %arg3: i32, %arg4: memref<1x1x1x4x32x8xf32, #tpu.memory_space<vmem>>, %arg5: memref<2x8x16xf32, #tpu.memory_space<vmem>>, %arg6: memref<1x1x4x1x8x32xf32, #tpu.memory_space<vmem>>) attributes {dimension_semantics = [#tpu.dimension_semantics<parallel>, #tpu.dimension_semantics<parallel>, #tpu.dimension_semantics<parallel>, #tpu.dimension_semantics<parallel>], iteration_bounds = array<i64: 2, 2, 2, 1>, scalar_prefetch = 0 : i64, scratch_operands = 0 : i64, tpu.core_type = #tpu.core_type<tc>, window_params = [{transform_indices = @transform_0, window_bounds = array<i64: 1, 1, 1, 4, 32, 8>}, {pipeline_mode = #tpu.pipeline_mode<synchronous>, transform_indices = @transform_1, window_bounds = array<i64: 2, 8, 16>}, {transform_indices = @transform_2, window_bounds = array<i64: 1, 1, 4, 1, 8, 32>}]} {
    %c0 = arith.constant 0 : index
    %c0_0 = arith.constant 0 : index
    %c0_1 = arith.constant 0 : index
    %c0_2 = arith.constant 0 : index
    %c0_3 = arith.constant 0 : index
    %c0_4 = arith.constant 0 : index
    %0 = vector.load %arg4[%c0, %c0_0, %c0_1, %c0_2, %c0_3, %c0_4] : memref<1x1x1x4x32x8xf32, #tpu.memory_space<vmem>>, vector<1x1x1x1x32x8xf32>
    %1 = vector.shape_cast %0 : vector<1x1x1x1x32x8xf32> to vector<32x8xf32>
    %c0_5 = arith.constant 0 : index
    %c0_6 = arith.constant 0 : index
    %c0_7 = arith.constant 0 : index
    %2 = vector.load %arg5[%c0_5, %c0_6, %c0_7] : memref<2x8x16xf32, #tpu.memory_space<vmem>>, vector<1x8x16xf32>
    %3 = vector.shape_cast %2 : vector<1x8x16xf32> to vector<8x16xf32>
    %cst = arith.constant dense<0.000000e+00> : vector<32x16xf32>
    %4 = tpu.matmul %1, %3, %cst {dimension_numbers = #tpu.dot_dimension_numbers<[1], [0], [0], [1], [0, 0, 1, 1], [], []>, precision = #tpu.contract_precision<fp32>} : vector<32x8xf32>, vector<8x16xf32>, vector<32x16xf32> -> vector<32x16xf32>
    %c0_8 = arith.constant 0 : index
    %c0_9 = arith.constant 0 : index
    %c0_10 = arith.constant 0 : index
    %c1 = arith.constant 1 : index
    %c0_11 = arith.constant 0 : index
    %c0_12 = arith.constant 0 : index
    %5 = vector.load %arg4[%c0_8, %c0_9, %c0_10, %c1, %c0_11, %c0_12] : memref<1x1x1x4x32x8xf32, #tpu.memory_space<vmem>>, vector<1x1x1x1x32x8xf32>
    %6 = vector.shape_cast %5 : vector<1x1x1x1x32x8xf32> to vector<32x8xf32>
    %c1_13 = arith.constant 1 : index
    %c0_14 = arith.constant 0 : index
    %c0_15 = arith.constant 0 : index
    %7 = vector.load %arg5[%c1_13, %c0_14, %c0_15] : memref<2x8x16xf32, #tpu.memory_space<vmem>>, vector<1x8x16xf32>
    %8 = vector.shape_cast %7 : vector<1x8x16xf32> to vector<8x16xf32>
    %cst_16 = arith.constant dense<0.000000e+00> : vector<32x16xf32>
    %9 = tpu.matmul %6, %8, %cst_16 {dimension_numbers = #tpu.dot_dimension_numbers<[1], [0], [0], [1], [0, 0, 1, 1], [], []>, precision = #tpu.contract_precision<fp32>} : vector<32x8xf32>, vector<8x16xf32>, vector<32x16xf32> -> vector<32x16xf32>
    %10 = arith.addf %4, %9 : vector<32x16xf32>
    %11 = vector.shape_cast %10 : vector<32x16xf32> to vector<4x1x8x16xf32>
    %c0_17 = arith.constant 0 : index
    %c0_18 = arith.constant 0 : index
    %c0_19 = arith.constant 0 : index
    %c0_20 = arith.constant 0 : index
    %c0_21 = arith.constant 0 : index
    %c0_22 = arith.constant 0 : index
    %12 = vector.load %arg6[%c0_17, %c0_18, %c0_19, %c0_20, %c0_21, %c0_22] : memref<1x1x4x1x8x32xf32, #tpu.memory_space<vmem>>, vector<1x1x4x1x8x16xf32>
    %13 = vector.shape_cast %12 : vector<1x1x4x1x8x16xf32> to vector<4x1x8x16xf32>
    %14 = vector.shape_cast %11 : vector<4x1x8x16xf32> to vector<1x1x4x1x8x16xf32>
    tpu.vector_store %arg6[%c0_17, %c0_18, %c0_19, %c0_20, %c0_21, %c0_22], %14 {strides = array<i32>} : memref<1x1x4x1x8x32xf32, #tpu.memory_space<vmem>>, vector<1x1x4x1x8x16xf32>,
    %c0_23 = arith.constant 0 : index
    %c0_24 = arith.constant 0 : index
    %c0_25 = arith.constant 0 : index
    %c2 = arith.constant 2 : index
    %c0_26 = arith.constant 0 : index
    %c0_27 = arith.constant 0 : index
    %15 = vector.load %arg4[%c0_23, %c0_24, %c0_25, %c2, %c0_26, %c0_27] : memref<1x1x1x4x32x8xf32, #tpu.memory_space<vmem>>, vector<1x1x1x1x32x8xf32>
    %16 = vector.shape_cast %15 : vector<1x1x1x1x32x8xf32> to vector<32x8xf32>
    %c0_28 = arith.constant 0 : index
    %c0_29 = arith.constant 0 : index
    %c0_30 = arith.constant 0 : index
    %17 = vector.load %arg5[%c0_28, %c0_29, %c0_30] : memref<2x8x16xf32, #tpu.memory_space<vmem>>, vector<1x8x16xf32>
    %18 = vector.shape_cast %17 : vector<1x8x16xf32> to vector<8x16xf32>
    %cst_31 = arith.constant dense<0.000000e+00> : vector<32x16xf32>
    %19 = tpu.matmul %16, %18, %cst_31 {dimension_numbers = #tpu.dot_dimension_numbers<[1], [0], [0], [1], [0, 0, 1, 1], [], []>, precision = #tpu.contract_precision<fp32>} : vector<32x8xf32>, vector<8x16xf32>, vector<32x16xf32> -> vector<32x16xf32>
    %c0_32 = arith.constant 0 : index
    %c0_33 = arith.constant 0 : index
    %c0_34 = arith.constant 0 : index
    %c3 = arith.constant 3 : index
    %c0_35 = arith.constant 0 : index
    %c0_36 = arith.constant 0 : index
    %20 = vector.load %arg4[%c0_32, %c0_33, %c0_34, %c3, %c0_35, %c0_36] : memref<1x1x1x4x32x8xf32, #tpu.memory_space<vmem>>, vector<1x1x1x1x32x8xf32>
    %21 = vector.shape_cast %20 : vector<1x1x1x1x32x8xf32> to vector<32x8xf32>
    %c1_37 = arith.constant 1 : index
    %c0_38 = arith.constant 0 : index
    %c0_39 = arith.constant 0 : index
    %22 = vector.load %arg5[%c1_37, %c0_38, %c0_39] : memref<2x8x16xf32, #tpu.memory_space<vmem>>, vector<1x8x16xf32>
    %23 = vector.shape_cast %22 : vector<1x8x16xf32> to vector<8x16xf32>
    %cst_40 = arith.constant dense<0.000000e+00> : vector<32x16xf32>
    %24 = tpu.matmul %21, %23, %cst_40 {dimension_numbers = #tpu.dot_dimension_numbers<[1], [0], [0], [1], [0, 0, 1, 1], [], []>, precision = #tpu.contract_precision<fp32>} : vector<32x8xf32>, vector<8x16xf32>, vector<32x16xf32> -> vector<32x16xf32>
    %25 = arith.addf %19, %24 : vector<32x16xf32>
    %26 = vector.shape_cast %25 : vector<32x16xf32> to vector<4x1x8x16xf32>
    %c0_41 = arith.constant 0 : index
    %c0_42 = arith.constant 0 : index
    %c0_43 = arith.constant 0 : index
    %c0_44 = arith.constant 0 : index
    %c0_45 = arith.constant 0 : index
    %c16 = arith.constant 16 : index
    %27 = vector.load %arg6[%c0_41, %c0_42, %c0_43, %c0_44, %c0_45, %c16] : memref<1x1x4x1x8x32xf32, #tpu.memory_space<vmem>>, vector<1x1x4x1x8x16xf32>
    %28 = vector.shape_cast %27 : vector<1x1x4x1x8x16xf32> to vector<4x1x8x16xf32>
    %29 = vector.shape_cast %26 : vector<4x1x8x16xf32> to vector<1x1x4x1x8x16xf32>
    tpu.vector_store %arg6[%c0_41, %c0_42, %c0_43, %c0_44, %c0_45, %c16], %29 {strides = array<i32>} : memref<1x1x4x1x8x32xf32, #tpu.memory_space<vmem>>, vector<1x1x4x1x8x16xf32>,
    return
  }
  func.func @transform_0(%arg0: i32, %arg1: i32, %arg2: i32, %arg3: i32) -> (i32, i32, i32, i32, i32, i32) {
    %c0_i32 = arith.constant 0 : i32
    %c0_i32_0 = arith.constant 0 : i32
    %c0_i32_1 = arith.constant 0 : i32
    return %arg0, %arg1, %arg2, %c0_i32, %arg3, %c0_i32_0 : i32, i32, i32, i32, i32, i32
  }
  func.func @transform_1(%arg0: i32, %arg1: i32, %arg2: i32, %arg3: i32) -> (i32, i32, i32) {
    %c0_i32 = arith.constant 0 : i32
    %c0_i32_0 = arith.constant 0 : i32
    %c0_i32_1 = arith.constant 0 : i32
    %c0_i32_2 = arith.constant 0 : i32
    return %c0_i32, %c0_i32_0, %c0_i32_1 : i32, i32, i32
  }
  func.func @transform_2(%arg0: i32, %arg1: i32, %arg2: i32, %arg3: i32) -> (i32, i32, i32, i32, i32, i32) {
    %c0_i32 = arith.constant 0 : i32
    %c0_i32_0 = arith.constant 0 : i32
    %c0_i32_1 = arith.constant 0 : i32
    return %arg0, %arg1, %arg3, %arg2, %c0_i32, %c0_i32_0 : i32, i32, i32, i32, i32, i32
  }
}

module attributes {stable_mosaic.version = 11 : i64} {
  func.func @_pixel_shuffle_kernel(%arg0: i32, %arg1: i32, %arg2: i32, %arg3: i32, %arg4: memref<1x1x1x4x32x8xf32, #tpu.memory_space<vmem>>, %arg5: memref<2x8x16xf32, #tpu.memory_space<vmem>>, %arg6: memref<1x1x4x1x8x32xf32, #tpu.memory_space<vmem>>) attributes {dimension_semantics = [#tpu.dimension_semantics<parallel>, #tpu.dimension_semantics<parallel>, #tpu.dimension_semantics<parallel>, #tpu.dimension_semantics<parallel>], iteration_bounds = array<i64: 2, 2, 2, 1>, scalar_prefetch = 0 : i64, scratch_operands = 0 : i64, tpu.core_type = #tpu.core_type<tc>, window_params = [{transform_indices = @transform_0, window_bounds = array<i64: 1, 1, 1, 4, 32, 8>}, {pipeline_mode = #tpu.pipeline_mode<synchronous>, transform_indices = @transform_1, window_bounds = array<i64: 2, 8, 16>}, {transform_indices = @transform_2, window_bounds = array<i64: 1, 1, 4, 1, 8, 32>}]} {
    %c0 = arith.constant 0 : index
    %c0_0 = arith.constant 0 : index
    %c0_1 = arith.constant 0 : index
    %c0_2 = arith.constant 0 : index
    %c0_3 = arith.constant 0 : index
    %c0_4 = arith.constant 0 : index
    %0 = vector.load %arg4[%c0, %c0_0, %c0_1, %c0_2, %c0_3, %c0_4] : memref<1x1x1x4x32x8xf32, #tpu.memory_space<vmem>>, vector<1x1x1x1x32x8xf32>
    %1 = vector.shape_cast %0 : vector<1x1x1x1x32x8xf32> to vector<32x8xf32>
    %c0_5 = arith.constant 0 : index
    %c0_6 = arith.constant 0 : index
    %c0_7 = arith.constant 0 : index
    %2 = vector.load %arg5[%c0_5, %c0_6, %c0_7] : memref<2x8x16xf32, #tpu.memory_space<vmem>>, vector<1x8x16xf32>
    %3 = vector.shape_cast %2 : vector<1x8x16xf32> to vector<8x16xf32>
    %cst = arith.constant dense<0.000000e+00> : vector<32x16xf32>
    %4 = tpu.matmul %1, %3, %cst {dimension_numbers = #tpu.dot_dimension_numbers<[1], [0], [0], [1], [0, 0, 1, 1], [], []>} : vector<32x8xf32>, vector<8x16xf32>, vector<32x16xf32> -> vector<32x16xf32>
    %c0_8 = arith.constant 0 : index
    %c0_9 = arith.constant 0 : index
    %c0_10 = arith.constant 0 : index
    %c1 = arith.constant 1 : index
    %c0_11 = arith.constant 0 : index
    %c0_12 = arith.constant 0 : index
    %5 = vector.load %arg4[%c0_8, %c0_9, %c0_10, %c1, %c0_11, %c0_12] : memref<1x1x1x4x32x8xf32, #tpu.memory_space<vmem>>, vector<1x1x1x1x32x8xf32>
    %6 = vector.shape_cast %5 : vector<1x1x1x1x32x8xf32> to vector<32x8xf32>
    %c1_13 = arith.constant 1 : index
    %c0_14 = arith.constant 0 : index
    %c0_15 = arith.constant 0 : index
    %7 = vector.load %arg5[%c1_13, %c0_14, %c0_15] : memref<2x8x16xf32, #tpu.memory_space<vmem>>, vector<1x8x16xf32>
    %8 = vector.shape_cast %7 : vector<1x8x16xf32> to vector<8x16xf32>
    %cst_16 = arith.constant dense<0.000000e+00> : vector<32x16xf32>
    %9 = tpu.matmul %6, %8, %cst_16 {dimension_numbers = #tpu.dot_dimension_numbers<[1], [0], [0], [1], [0, 0, 1, 1], [], []>} : vector<32x8xf32>, vector<8x16xf32>, vector<32x16xf32> -> vector<32x16xf32>
    %10 = arith.addf %4, %9 : vector<32x16xf32>
    %11 = vector.shape_cast %10 : vector<32x16xf32> to vector<4x1x8x16xf32>
    %c0_17 = arith.constant 0 : index
    %c0_18 = arith.constant 0 : index
    %c0_19 = arith.constant 0 : index
    %c0_20 = arith.constant 0 : index
    %c0_21 = arith.constant 0 : index
    %c0_22 = arith.constant 0 : index
    %12 = vector.load %arg6[%c0_17, %c0_18, %c0_19, %c0_20, %c0_21, %c0_22] : memref<1x1x4x1x8x32xf32, #tpu.memory_space<vmem>>, vector<1x1x4x1x8x16xf32>
    %13 = vector.shape_cast %12 : vector<1x1x4x1x8x16xf32> to vector<4x1x8x16xf32>
    %14 = vector.shape_cast %11 : vector<4x1x8x16xf32> to vector<1x1x4x1x8x16xf32>
    tpu.vector_store %arg6[%c0_17, %c0_18, %c0_19, %c0_20, %c0_21, %c0_22], %14 {strides = array<i32>} : memref<1x1x4x1x8x32xf32, #tpu.memory_space<vmem>>, vector<1x1x4x1x8x16xf32>,
    %c0_23 = arith.constant 0 : index
    %c0_24 = arith.constant 0 : index
    %c0_25 = arith.constant 0 : index
    %c2 = arith.constant 2 : index
    %c0_26 = arith.constant 0 : index
    %c0_27 = arith.constant 0 : index
    %15 = vector.load %arg4[%c0_23, %c0_24, %c0_25, %c2, %c0_26, %c0_27] : memref<1x1x1x4x32x8xf32, #tpu.memory_space<vmem>>, vector<1x1x1x1x32x8xf32>
    %16 = vector.shape_cast %15 : vector<1x1x1x1x32x8xf32> to vector<32x8xf32>
    %c0_28 = arith.constant 0 : index
    %c0_29 = arith.constant 0 : index
    %c0_30 = arith.constant 0 : index
    %17 = vector.load %arg5[%c0_28, %c0_29, %c0_30] : memref<2x8x16xf32, #tpu.memory_space<vmem>>, vector<1x8x16xf32>
    %18 = vector.shape_cast %17 : vector<1x8x16xf32> to vector<8x16xf32>
    %cst_31 = arith.constant dense<0.000000e+00> : vector<32x16xf32>
    %19 = tpu.matmul %16, %18, %cst_31 {dimension_numbers = #tpu.dot_dimension_numbers<[1], [0], [0], [1], [0, 0, 1, 1], [], []>} : vector<32x8xf32>, vector<8x16xf32>, vector<32x16xf32> -> vector<32x16xf32>
    %c0_32 = arith.constant 0 : index
    %c0_33 = arith.constant 0 : index
    %c0_34 = arith.constant 0 : index
    %c3 = arith.constant 3 : index
    %c0_35 = arith.constant 0 : index
    %c0_36 = arith.constant 0 : index
    %20 = vector.load %arg4[%c0_32, %c0_33, %c0_34, %c3, %c0_35, %c0_36] : memref<1x1x1x4x32x8xf32, #tpu.memory_space<vmem>>, vector<1x1x1x1x32x8xf32>
    %21 = vector.shape_cast %20 : vector<1x1x1x1x32x8xf32> to vector<32x8xf32>
    %c1_37 = arith.constant 1 : index
    %c0_38 = arith.constant 0 : index
    %c0_39 = arith.constant 0 : index
    %22 = vector.load %arg5[%c1_37, %c0_38, %c0_39] : memref<2x8x16xf32, #tpu.memory_space<vmem>>, vector<1x8x16xf32>
    %23 = vector.shape_cast %22 : vector<1x8x16xf32> to vector<8x16xf32>
    %cst_40 = arith.constant dense<0.000000e+00> : vector<32x16xf32>
    %24 = tpu.matmul %21, %23, %cst_40 {dimension_numbers = #tpu.dot_dimension_numbers<[1], [0], [0], [1], [0, 0, 1, 1], [], []>} : vector<32x8xf32>, vector<8x16xf32>, vector<32x16xf32> -> vector<32x16xf32>
    %25 = arith.addf %19, %24 : vector<32x16xf32>
    %26 = vector.shape_cast %25 : vector<32x16xf32> to vector<4x1x8x16xf32>
    %c0_41 = arith.constant 0 : index
    %c0_42 = arith.constant 0 : index
    %c0_43 = arith.constant 0 : index
    %c0_44 = arith.constant 0 : index
    %c0_45 = arith.constant 0 : index
    %c16 = arith.constant 16 : index
    %27 = vector.load %arg6[%c0_41, %c0_42, %c0_43, %c0_44, %c0_45, %c16] : memref<1x1x4x1x8x32xf32, #tpu.memory_space<vmem>>, vector<1x1x4x1x8x16xf32>
    %28 = vector.shape_cast %27 : vector<1x1x4x1x8x16xf32> to vector<4x1x8x16xf32>
    %29 = vector.shape_cast %26 : vector<4x1x8x16xf32> to vector<1x1x4x1x8x16xf32>
    tpu.vector_store %arg6[%c0_41, %c0_42, %c0_43, %c0_44, %c0_45, %c16], %29 {strides = array<i32>} : memref<1x1x4x1x8x32xf32, #tpu.memory_space<vmem>>, vector<1x1x4x1x8x16xf32>,
    return
  }
  func.func @transform_0(%arg0: i32, %arg1: i32, %arg2: i32, %arg3: i32) -> (i32, i32, i32, i32, i32, i32) {
    %c0_i32 = arith.constant 0 : i32
    %c0_i32_0 = arith.constant 0 : i32
    %c0_i32_1 = arith.constant 0 : i32
    return %arg0, %arg1, %arg2, %c0_i32, %arg3, %c0_i32_0 : i32, i32, i32, i32, i32, i32
  }
  func.func @transform_1(%arg0: i32, %arg1: i32, %arg2: i32, %arg3: i32) -> (i32, i32, i32) {
    %c0_i32 = arith.constant 0 : i32
    %c0_i32_0 = arith.constant 0 : i32
    %c0_i32_1 = arith.constant 0 : i32
    %c0_i32_2 = arith.constant 0 : i32
    return %c0_i32, %c0_i32_0, %c0_i32_1 : i32, i32, i32
  }
  func.func @transform_2(%arg0: i32, %arg1: i32, %arg2: i32, %arg3: i32) -> (i32, i32, i32, i32, i32, i32) {
    %c0_i32 = arith.constant 0 : i32
    %c0_i32_0 = arith.constant 0 : i32
    %c0_i32_1 = arith.constant 0 : i32
    return %arg0, %arg1, %arg3, %arg2, %c0_i32, %c0_i32_0 : i32, i32, i32, i32, i32, i32
  }
}

</mosaic_0001>

<bundles_post_ra>
// kernel: tpu_custom_call.1
= control target key start
LH: loop header
LB: loop body
LE: loop exit
PB: predicated region body
PF: predicated region fallthrough
CT: control target
= control target key end

     0   :  { %7 = vsyncpa [#allocation3], 0  ;;  %s3707_s0 = inlined_call_operand.vmem [shape: f32[2,2,2,4,32,8], index: 0, kind: input, shape index: {}]   ;;  %s3708_s1 = inlined_call_operand.vmem [shape: f32[2,8,16], index: 1, kind: input, shape index: {}]   ;;  %s3709_s2 = inlined_call_operand.hbm [shape: f32[2,2,4,2,8,32], index: 2, kind: output, shape index: {}]  }
   0x1   :  { %9 = vsyncpa [#allocation3 + $0x1], 0  ;;  %s3307_s9 = smov 0   ;;  %s3309_s10 = smov 0  }
   0x2   :  { %s3311_s11 = smov 0   ;;  %s3313_s12 = smov 0  }
   0x3   :  { %s3315_s13 = smov 0   ;;  %s3317_s14 = smov 0  }
   0x4   :  { %s3319_s15 = smov 0   ;;  %s3321_s16 = smov 0  }
   0x5   :  { %s3323_s17 = smov 0   ;;  %s3325_s18 = smov 0  }
   0x6 LB: > { %s2744_s19 = sadd.s32 4294967295, %s3285_s18   ;;  %s33_s20 = sadd.s32 1, %s3273_s15  ;;  %s3285_s18 = sphi %s3325_s18, %s15_s18   ;;  %s3281_s17 = sphi %s3323_s17, %s3720_s17   ;;  %s3277_s16 = sphi %s3321_s16, %s3719_s16   ;;  %s3273_s15 = sphi %s3319_s15, %s3718_s15   ;;  %s3269_s14 = sphi %s3317_s14, %s3717_s14   ;;  %s3265_s13 = sphi %s3315_s13, %s3716_s13   ;;  %s3261_s12 = sphi %s3313_s12, %s3715_s12   ;;  %s3257_s11 = sphi %s3311_s11, %s3714_s11   ;;  %s3253_s10 = sphi %s3309_s10, %s3713_s10   ;;  %s3249_s9 = sphi %s3307_s9, %s3712_s9  }
   0x7   : > { %p35_p0 = scmp.ge.s32.totalorder %s33_s20, 2  ;;  %s37_s21 = sadd.s32 1, %s3277_s16 }
   0x8   : > { %s2745_s22 = sadd.s32 4294967294, %s3285_s18   ;;  %p117_p1 = scmp.ne.s32.totalorder %s3257_s11, %s3253_s10 }
   0x9   : > { %s3722_s20 = smov (%p35_p0, %s33_s20), 0  ;;  %s3724_s21 = smov (!%p35_p0, %s37_s21), %s3277_s16 }
   0xa   : > { %s41_s23 = sadd.s32 1, %s3281_s17  ;;  %p118_p2 = scmp.eq.s32.totalorder %s2744_s19, 7 }
   0xb   : > { %p39_p3 = scmp.ge.s32.totalorder %s3724_s21, 2  ;;  %p123_p4 = scmp.ne.s32.totalorder %s3253_s10, %s3249_s9 }
   0xc   : > { %p3369_p5 = por %p118_p2, %p117_p1  ;;  %p124_p6 = scmp.eq.s32.totalorder %s2745_s22, 7 }
   0xd   : > { %s3726_s21 = smov (%p39_p3, %s3724_s21), 0  ;;  %s3728_s23 = smov (!%p39_p3, %s41_s23), %s3281_s17 }
   0xe   : > { %p3376_p7 = por %p124_p6, %p123_p4  ;;  %p43_p8 = scmp.ge.s32.totalorder %s3728_s23, 2 }
   0xf   : > { %p2748_p9 = scmp.ge.s32.totalorder %s3285_s18, 1  ;;  %s99_s26 = ssub.s32 %s3277_s16, %s3726_s21 }
  0x10   : > { %p166_p10 = scmp.lt.s32.totalorder %s3285_s18, 9  ;;  %s3730_s23 = smov (%p43_p8, %s3728_s23), 0 }
  0x11   : > { %s103_s27 = ssub.s32 %s3273_s15, %s3722_s20  ;;  %s98_s28 = ssub.s32 %s3281_s17, %s3730_s23 }
  0x12   : > { %p167_p11 = pnand %p2748_p9, %p166_p10  ;;  %s100_s29 = sor.u32 %s99_s26, %s98_s28 }
  0x13   : > { %s104_s30 = sor.u32 %s103_s27, %s100_s29  ;;  %s107_s3 = sadd.s32 1, %s3257_s11 }
  0x14   : > { %p105_p12 = scmp.eq.s32.totalorder %s104_s30, 0  ;;  %170 = sbr.rel (%p167_p11) target bundleno = 472 (0x1d8), region = 28 }
  0x15   : > { %p201_p13 = scmp.lt.s32.totalorder (!%p167_p11), %s3269_s14, 1  ;;  %p203_p0 = scmp.lt.s32.totalorder (!%p167_p11), %s3265_s13, 1 }
  0x16   : > { %s3392_s4 = scalar_select %p105_p12, %s3257_s11, %s107_s3  }
  0x17   : > { %p205_p1 = scmp.lt.s32.totalorder (!%p167_p11), %s3261_s12, 1 }
  0x19   : > { %v2758_v0 = vld [vmem:[%s3708_s1 + $0x8] sm:$0xff]  ;;  %s202_s7 = scalar_select %p201_p13, %s3269_s14, 1  ;;  %v223_v3 = vld [vmem:[%s3708_s1] sm:$0xff]  ;;  %vm231_vm0 = vcmask 64512   ;;  %vm1406_vm1 = vcmask 130048   ;;  %vm2613_vm2 = vcmask 261248  }
  0x1a   : > { %v3399_v1 = vand.u32 4294901760, %v2758_v0  ;;  %s204_s8 = scalar_select %p203_p0, %s3265_s13, 1  ;;  %v3419_v6 = vand.u32 4294901760, %v223_v3 }
  0x1b   : > { %s206_s19 = scalar_select %p205_p1, %s3261_s12, 1 }
  0x1c   : > { %2894 = vmatprep.subr.mxu0 %v3399_v1  ;;  %v3405_v2 = vsub.f32 %v2758_v0, %v3399_v1  ;;  %s2751_s27 = sshll.u32 %s204_s8, 5  ;;  %s2752_s28 = sshll.u32 %s202_s7, 6  ;;  %v3433_v11 = vsub.f32 %v223_v3, %v3419_v6 }
  0x1d   : > { %2895 = vmatpush3.msra.mxu0 %v3399_v1  ;;  %s2750_s29 = sshll.u32 %s206_s19, 4  ;;  %s197_s7 = sand.u32 1, %s3253_s10  }
  0x1e   : > { %v3414_v4 = vand.u32 4294901760, %v3405_v2  ;;  %2910 = vmatprep.subr.mxu0 %v3405_v2  ;;  %s212_s30 = sadd.s32 %s2751_s27, %s2750_s29  ;;  %v3455_v24 = vand.u32 4294901760, %v3433_v11  ;;  %s2749_s8 = sshll.u32 %s197_s7, 5 }
  0x1f   : > { %s214_s3 = sadd.s32 %s2752_s28, %s212_s30  ;;  %s3623_s19 = scalar_lea.vmem [#allocation2], %s2749_s8 }
  0x20   : > { %v384_v5 = vsub.f32 %v3405_v2, %v3414_v4  ;;  %s2753_s5 = sshll.u32 %s214_s3, 3  ;;  %v971_v33 = vsub.f32 %v3433_v11, %v3455_v24  ;;  %s3287_s27 = smov 16  }
  0x21   : > { %s3426_s26 = scalar_lea.vmem %s3707_s0, %s2753_s5  ;;  %s2769_s28 = sshll.u32 %s3265_s13, 3 }
  0x22   : > { %v3421_v7 = vand.u32 4294901760, %v384_v5  ;;  %v2754_v8 = vld [vmem:[%s3426_s26 + $0x20] sm:$0xff]  ;;  %v2755_v9 = vld [vmem:[%s3426_s26 + $0x28] sm:$0xff]  ;;  %v2756_v10 = vld [vmem:[%s3426_s26 + $0x30] sm:$0xff]  ;;  %v3473_v42 = vand.u32 4294901760, %v971_v33  ;;  %s2633_s29 = sadd.s32 %s3261_s12, %s2769_s28  ;;  %s2770_s30 = sshll.u32 %s3269_s14, 4 }
  0x23   : > { %v233_v12 = vsel %vm231_vm0, %v2754_v8, 0  ;;  %v236_v13 = vsel %vm231_vm0, %v2755_v9, 0  ;;  %v239_v14 = vsel %vm231_vm0, %v2756_v10, 0  ;;  %v2757_v15 = vld [vmem:[%s3426_s26 + $0x38] sm:$0xff]  ;;  %v219_v34 = vld [vmem:[%s3426_s26] sm:$0xff]  ;;  %v220_v40 = vld [vmem:[%s3426_s26 + $0x8] sm:$0xff]  ;;  %s2635_s3 = sadd.s32 %s2770_s30, %s2633_s29 }
  0x24   : > { %2902 = vmatprep.subr.mxu1 %v3421_v7  ;;  %v3440_v16 = vand.u32 4294901760, %v233_v12  ;;  %v3442_v17 = vand.u32 4294901760, %v236_v13  ;;  %v3445_v18 = vand.u32 4294901760, %v239_v14  ;;  %v242_v19 = vsel %vm231_vm0, %v2757_v15, 0  ;;  %v2759_v41 = vld [vmem:[%s3426_s26 + $0x40] sm:$0xff]  ;;  %v221_v43 = vld [vmem:[%s3426_s26 + $0x10] sm:$0xff] }
  0x25   : > { %2903 = vmatpush3.msra.mxu1 %v3421_v7  ;;  %v3448_v20 = vand.u32 4294901760, %v242_v19  ;;  %v820_v39 = vsel %vm231_vm0, %v219_v34, 0  ;;  %v2760_v45 = vld [vmem:[%s3426_s26 + $0x48] sm:$0xff]  ;;  %v2761_v46 = vld [vmem:[%s3426_s26 + $0x50] sm:$0xff]  ;;  %v823_v48 = vsel %vm231_vm0, %v220_v40, 0  ;;  %v3483_v49 = vsel %vm231_vm0, %v2759_v41, 0 }
  0x26   : > { %2918 = vmatprep.subr.mxu1 %v3399_v1  ;;  %v311_v21 = vsub.f32 %v233_v12, %v3440_v16  ;;  %2904 = vmatprep.mubr.f32.mxu1 %v3440_v16  ;;  %v321_v22 = vsub.f32 %v236_v13, %v3442_v17  ;;  %v331_v23 = vsub.f32 %v239_v14, %v3445_v18  ;;  %v3479_v47 = vand.u32 4294901760, %v820_v39  ;;  %v222_v51 = vld [vmem:[%s3426_s26 + $0x18] sm:$0xff]  ;;  %v2763_v14 = vld [vmem:[%s3426_s26 + $0x60] sm:$0xff]  ;;  %s2771_s5 = sshll.u32 %s2635_s3, 7  ;;  %s2638_s6 = sshll.u32 %s3623_s19, 4  ;;  %s3645_s6 = int_to_ptr.vmem [resolvable:$true] %s2638_s6 }
  0x27   : > { %2905 = vmatmul.mubr.f32.vlgmr.msra.gmra.mxu1 %v3442_v17  ;;  %v3459_v25 = vsub.f32 %v242_v19, %v3448_v20  ;;  %v826_v50 = vsel %vm231_vm0, %v221_v43, 0  ;;  %v2762_v52 = vld [vmem:[%s3426_s26 + $0x58] sm:$0xff]  ;;  %v3492_v53 = vsel %vm231_vm0, %v2760_v45, 0  ;;  %v3495_v54 = vsel %vm231_vm0, %v2761_v46, 0  ;;  %v2764_v19 = vld [vmem:[%s3426_s26 + $0x68] sm:$0xff]  ;;  %s3643_s8 = scalar_lea.hbm %s3709_s2, %s2771_s5  ;;  %s3650_s12 = scalar_lea.sflag [#allocation3], %s197_s7 }
  0x28   : > { %v312_v26 = vand.u32 4294901760, %v311_v21  ;;  %v322_v27 = vand.u32 4294901760, %v321_v22  ;;  %2919 = vmatpush3.msra.mxu1 %v3399_v1  ;;  %v332_v28 = vand.u32 4294901760, %v331_v23  ;;  %2907 = vmatprep.mubr.f32.mxu1 %v3445_v18  ;;  %v3497_v55 = vand.u32 4294901760, %v823_v48  ;;  %s3177_s13 = scalar_lea.vmem %s3645_s6, 512  ;;  %s3288_s14 = smov [#allocation2]  }
  0x29   : > { %v342_v29 = vand.u32 4294901760, %v3459_v25  ;;  %2934 = vmatprep.subr.mxu1 %v3399_v1  ;;  %v898_v56 = vsub.f32 %v820_v39, %v3479_v47  ;;  %v3501_v57 = vand.u32 4294901760, %v826_v50  ;;  %v829_v58 = vsel %vm231_vm0, %v222_v51, 0  ;;  %p3178_p2 = scmp.ne.s32.totalorder %s3645_s6, %s3177_s13 }
  0x2a   : > { %v313_v30 = vsub.f32 %v311_v21, %v312_v26  ;;  %v323_v31 = vsub.f32 %v321_v22, %v322_v27  ;;  %v333_v32 = vsub.f32 %v331_v23, %v332_v28  ;;  %v3505_v59 = vsel %vm231_vm0, %v2762_v52, 0 }
  0x2b   : > { %v343_v35 = vsub.f32 %v3459_v25, %v342_v29  ;;  %2908 = vmatmul.mubr.f32.gmra.mxu1 %v3448_v20  ;;  %v908_v60 = vsub.f32 %v823_v48, %v3497_v55  ;;  %v3509_v61 = vand.u32 4294901760, %v829_v58  ;;  %v899_v62 = vand.u32 4294901760, %v898_v56  ;;  %p3179_p3 = pnand %p3178_p2, %p3369_p5 }
  0x2c   : > { %v314_v36 = vand.u32 4294901760, %v313_v30  ;;  %v324_v37 = vand.u32 4294901760, %v323_v31  ;;  %v334_v38 = vand.u32 4294901760, %v333_v32  ;;  %2920 = vmatprep.mubr.f32.mxu1 %v312_v26  ;;  %v918_v63 = vsub.f32 %v826_v50, %v3501_v57  ;;  %v2766_v26 = vld [vmem:[%s3426_s26 + $0x78] sm:$0xff] }
  0x2d   : > { %v344_v44 = vand.u32 4294901760, %v343_v35  ;;  %v909_v0 = vand.u32 4294901760, %v908_v60  ;;  %v928_v3 = vsub.f32 %v829_v58, %v3509_v61  ;;  %v900_v5 = vsub.f32 %v898_v56, %v899_v62  ;;  %p3180_p4 = pneg %p3179_p3 }
  0x2e   : > { %2896 = vmatprep.mubr.f32.mxu0 %v314_v36  ;;  %v919_v8 = vand.u32 4294901760, %v918_v63  ;;  %v1433_v30 = vsel %vm231_vm0, %v2766_v26, 0  ;;  %v3584_v48 = vand.u32 4294901760, %v3492_v53  ;;  %v2108_v50 = vand.u32 4294901760, %v3495_v54 }
  0x2f   : > { %2897 = vmatmul.mubr.f32.vlgmr.msra.gmra.mxu0 %v324_v37  ;;  %2921 = vmatmul.mubr.f32.vlgmr.msra.gmra.mxu1 %v322_v27  ;;  %v910_v9 = vsub.f32 %v908_v60, %v909_v0  ;;  %v929_v10 = vand.u32 4294901760, %v928_v3  ;;  %v901_v12 = vand.u32 4294901760, %v900_v5  ;;  %v3554_v32 = vand.u32 4294901760, %v1433_v30 }
  0x30   : > { %2911 = vmatpush3.msra.mxu0 %v3405_v2  ;;  %2899 = vmatprep.mubr.f32.mxu0 %v334_v38  ;;  %v920_v13 = vsub.f32 %v918_v63, %v919_v8  ;;  %v2118_v51 = vand.u32 4294901760, %v3505_v59 }
  0x31   : > { %2926 = vmatprep.subr.mxu0 %v3414_v4  ;;  %2935 = vmatpush3.msra.mxu1 %v3399_v1  ;;  %v911_v15 = vand.u32 4294901760, %v910_v9  ;;  %v1532_v36 = vsub.f32 %v1433_v30, %v3554_v32 }
  0x32   : > { %2923 = vmatprep.mubr.f32.mxu1 %v332_v28  ;;  %2950 = vmatprep.subr.mxu1 %v3473_v42 }
  0x33   : > { %2900 = vmatmul.mubr.f32.gmra.mxu0 %v344_v44  ;;  %2924 = vmatmul.mubr.f32.gmra.mxu1 %v342_v29 }
  0x34   : > { %2912 = vmatprep.mubr.f32.mxu0 %v311_v21  ;;  %2936 = vmatprep.mubr.f32.mxu1 %v3440_v16  ;;  %v2765_v21 = vld [vmem:[%s3426_s26 + $0x70] sm:$0xff] }
  0x37   : > { %2913 = vmatmul.mubr.f32.vlgmr.msra.gmra.mxu0 %v321_v22  ;;  %2937 = vmatmul.mubr.f32.vlgmr.msra.gmra.mxu1 %v3442_v17 }
  0x38   : > { %2927 = vmatpush3.msra.mxu0 %v3414_v4  ;;  %2915 = vmatprep.mubr.f32.mxu0 %v331_v23 }
  0x39   : > { %2942 = vmatprep.subr.mxu0 %v3419_v6  ;;  %2951 = vmatpush3.msra.mxu1 %v3473_v42 }
  0x3a   : > { %2939 = vmatprep.mubr.f32.mxu1 %v3445_v18  ;;  %2966 = vmatprep.subr.mxu1 %v3419_v6 }
  0x3b   : > { %2916 = vmatmul.mubr.f32.gmra.mxu0 %v3459_v25  ;;  %2940 = vmatmul.mubr.f32.gmra.mxu1 %v3448_v20  ;;  %v1430_v25 = vsel %vm231_vm0, %v2765_v21, 0 }
  0x3c   : > { %2928 = vmatprep.mubr.f32.mxu0 %v3440_v16  ;;  %2952 = vmatprep.mubr.f32.mxu1 %v3479_v47  ;;  %v930_v16 = vsub.f32 %v928_v3, %v929_v10  ;;  %v3549_v29 = vand.u32 4294901760, %v1430_v25 }
  0x3e   : > { %v931_v22 = vand.u32 4294901760, %v930_v16  ;;  %v1522_v34 = vsub.f32 %v1430_v25, %v3549_v29 }
  0x3f   : > { %2929 = vmatmul.mubr.f32.vlgmr.msra.gmra.mxu0 %v3442_v17  ;;  %2953 = vmatmul.mubr.f32.vlgmr.msra.gmra.mxu1 %v3497_v55  ;;  %v921_v17 = vand.u32 4294901760, %v920_v13 }
  0x40   : > { %2943 = vmatpush3.msra.mxu0 %v3419_v6  ;;  %2931 = vmatprep.mubr.f32.mxu0 %v3445_v18  ;;  %v1424_v18 = vsel %vm231_vm0, %v2763_v14, 0  ;;  %v1523_v38 = vand.u32 4294901760, %v1522_v34 }
  0x41   : > { %2958 = vmatprep.subr.mxu0 %v3433_v11  ;;  %2967 = vmatpush3.msra.mxu1 %v3419_v6  ;;  %v3537_v23 = vand.u32 4294901760, %v1424_v18 }
  0x42   : > { %2955 = vmatprep.mubr.f32.mxu1 %v3501_v57  ;;  %2982 = vmatprep.subr.mxu1 %v3419_v6  ;;  %v1524_v41 = vsub.f32 %v1522_v34, %v1523_v38 }
  0x43   : > { %2932 = vmatmul.mubr.f32.gmra.mxu0 %v3448_v20  ;;  %2956 = vmatmul.mubr.f32.gmra.mxu1 %v3509_v61  ;;  %v1427_v20 = vsel %vm231_vm0, %v2764_v19, 0  ;;  %v1502_v28 = vsub.f32 %v1424_v18, %v3537_v23 }
  0x44   : > { %2944 = vmatprep.mubr.f32.mxu0 %v901_v12  ;;  %2968 = vmatprep.mubr.f32.mxu1 %v899_v62  ;;  %v3545_v27 = vand.u32 4294901760, %v1427_v20  ;;  %v1525_v45 = vand.u32 4294901760, %v1524_v41 }
  0x45   : > { %v1503_v33 = vand.u32 4294901760, %v1502_v28 }
  0x46   : > { %v1512_v31 = vsub.f32 %v1427_v20, %v3545_v27 }
  0x47   : > { %2945 = vmatmul.mubr.f32.vlgmr.msra.gmra.mxu0 %v911_v15  ;;  %2969 = vmatmul.mubr.f32.vlgmr.msra.gmra.mxu1 %v909_v0  ;;  %v1504_v37 = vsub.f32 %v1502_v28, %v1503_v33 }
  0x48   : > { %2959 = vmatpush3.msra.mxu0 %v3433_v11  ;;  %2947 = vmatprep.mubr.f32.mxu0 %v921_v17  ;;  %v1513_v35 = vand.u32 4294901760, %v1512_v31 }
  0x49   : > { %2974 = vmatprep.subr.mxu0 %v3455_v24  ;;  %2983 = vmatpush3.msra.mxu1 %v3419_v6  ;;  %v1505_v40 = vand.u32 4294901760, %v1504_v37 }
  0x4a   : > { %2971 = vmatprep.mubr.f32.mxu1 %v919_v8  ;;  %2998 = vmatprep.subr.mxu1 %v3421_v7  ;;  %v1514_v39 = vsub.f32 %v1512_v31, %v1513_v35 }
  0x4b   : > { %2948 = vmatmul.mubr.f32.gmra.mxu0 %v931_v22  ;;  %2972 = vmatmul.mubr.f32.gmra.mxu1 %v929_v10 }
  0x4c   : > { %2960 = vmatprep.mubr.f32.mxu0 %v898_v56  ;;  %2984 = vmatprep.mubr.f32.mxu1 %v3479_v47  ;;  %v1515_v43 = vand.u32 4294901760, %v1514_v39 }
  0x4f   : > { %2961 = vmatmul.mubr.f32.vlgmr.msra.gmra.mxu0 %v908_v60  ;;  %2985 = vmatmul.mubr.f32.vlgmr.msra.gmra.mxu1 %v3497_v55 }
  0x50   : > { %2975 = vmatpush3.msra.mxu0 %v3455_v24  ;;  %2963 = vmatprep.mubr.f32.mxu0 %v918_v63 }
  0x51   : > { %2990 = vmatprep.subr.mxu0 %v3399_v1  ;;  %2999 = vmatpush3.msra.mxu1 %v3421_v7  ;;  %v1533_v7 = vand.u32 4294901760, %v1532_v36 }
  0x52   : > { %2987 = vmatprep.mubr.f32.mxu1 %v3501_v57  ;;  %3014 = vmatprep.subr.mxu1 %v3399_v1 }
  0x53   : > { %2964 = vmatmul.mubr.f32.gmra.mxu0 %v928_v3  ;;  %2988 = vmatmul.mubr.f32.gmra.mxu1 %v3509_v61  ;;  %v1534_v44 = vsub.f32 %v1532_v36, %v1533_v7 }
  0x54   : > { %2976 = vmatprep.mubr.f32.mxu0 %v3479_v47  ;;  %3000 = vmatprep.mubr.f32.mxu1 %v3537_v23  ;;  %v3578_v47 = vand.u32 4294901760, %v3483_v49 }
  0x55   : > { %v1535_v46 = vand.u32 4294901760, %v1534_v44 }
  0x57   : > { %2977 = vmatmul.mubr.f32.vlgmr.msra.gmra.mxu0 %v3497_v55  ;;  %3001 = vmatmul.mubr.f32.vlgmr.msra.gmra.mxu1 %v3545_v27  ;;  %v2109_v55 = vsub.f32 %v3495_v54, %v2108_v50 }
  0x58   : > { %2991 = vmatpush3.msra.mxu0 %v3399_v1  ;;  %2979 = vmatprep.mubr.f32.mxu0 %v3501_v57 }
  0x59   : > { %3006 = vmatprep.subr.mxu0 %v3405_v2  ;;  %3015 = vmatpush3.msra.mxu1 %v3399_v1  ;;  %v2110_v54 = vand.u32 4294901760, %v2109_v55 }
  0x5a   : > { %3003 = vmatprep.mubr.f32.mxu1 %v3549_v29  ;;  %3030 = vmatprep.subr.mxu1 %v3399_v1 }
  0x5b   : > { %2980 = vmatmul.mubr.f32.gmra.mxu0 %v3509_v61  ;;  %3004 = vmatmul.mubr.f32.gmra.mxu1 %v3554_v32  ;;  %v2111_v58 = vsub.f32 %v2109_v55, %v2110_v54 }
  0x5c   : > { %2992 = vmatprep.mubr.f32.mxu0 %v1505_v40  ;;  %3016 = vmatprep.mubr.f32.mxu1 %v1503_v33 }
  0x5d   : > { %v2112_v61 = vand.u32 4294901760, %v2111_v58 }
  0x5f   : > { %2993 = vmatmul.mubr.f32.vlgmr.msra.gmra.mxu0 %v1515_v43  ;;  %3017 = vmatmul.mubr.f32.vlgmr.msra.gmra.mxu1 %v1513_v35 }
  0x60   : > { %3007 = vmatpush3.msra.mxu0 %v3405_v2  ;;  %2995 = vmatprep.mubr.f32.mxu0 %v1525_v45  ;;  %v2089_v2 = vsub.f32 %v3483_v49, %v3578_v47 }
  0x61   : > { %3022 = vmatprep.subr.mxu0 %v3414_v4  ;;  %3031 = vmatpush3.msra.mxu1 %v3399_v1  ;;  %v2099_v1 = vsub.f32 %v3492_v53, %v3584_v48  ;;  %v2119_v53 = vsub.f32 %v3505_v59, %v2118_v51 }
  0x62   : > { %3019 = vmatprep.mubr.f32.mxu1 %v1523_v38  ;;  %3046 = vmatprep.subr.mxu1 %v3473_v42  ;;  %v2090_v52 = vand.u32 4294901760, %v2089_v2 }
  0x63   : > { %2996 = vmatmul.mubr.f32.gmra.mxu0 %v1535_v46  ;;  %3020 = vmatmul.mubr.f32.gmra.mxu1 %v1533_v7  ;;  %v2100_v49 = vand.u32 4294901760, %v2099_v1 }
  0x64   : > { %3008 = vmatprep.mubr.f32.mxu0 %v1502_v28  ;;  %3032 = vmatprep.mubr.f32.mxu1 %v3537_v23 }
  0x65   : > { %v2101_v56 = vsub.f32 %v2099_v1, %v2100_v49 }
  0x67   : > { %3009 = vmatmul.mubr.f32.vlgmr.msra.gmra.mxu0 %v1512_v31  ;;  %3033 = vmatmul.mubr.f32.vlgmr.msra.gmra.mxu1 %v3545_v27  ;;  %v2102_v59 = vand.u32 4294901760, %v2101_v56 }
  0x68   : > { %3023 = vmatpush3.msra.mxu0 %v3414_v4  ;;  %3011 = vmatprep.mubr.f32.mxu0 %v1522_v34  ;;  %v2091_v4 = vsub.f32 %v2089_v2, %v2090_v52 }
  0x69   : > { %3038 = vmatprep.subr.mxu0 %v3419_v6  ;;  %3047 = vmatpush3.msra.mxu1 %v3473_v42  ;;  %v2120_v42 = vand.u32 4294901760, %v2119_v53 }
  0x6a   : > { %3035 = vmatprep.mubr.f32.mxu1 %v3549_v29  ;;  %3062 = vmatprep.subr.mxu1 %v3419_v6  ;;  %v2092_v57 = vand.u32 4294901760, %v2091_v4 }
  0x6b   : > { %3012 = vmatmul.mubr.f32.gmra.mxu0 %v1532_v36  ;;  %3036 = vmatmul.mubr.f32.gmra.mxu1 %v3554_v32  ;;  %v2121_v60 = vsub.f32 %v2119_v53, %v2120_v42 }
  0x6c   : > { %3024 = vmatprep.mubr.f32.mxu0 %v3537_v23  ;;  %3048 = vmatprep.mubr.f32.mxu1 %v3578_v47 }
  0x6d   : > { %v2122_v62 = vand.u32 4294901760, %v2121_v60 }
  0x6f   : > { %3025 = vmatmul.mubr.f32.vlgmr.msra.gmra.mxu0 %v3545_v27  ;;  %3049 = vmatmul.mubr.f32.vlgmr.msra.gmra.mxu1 %v3584_v48 }
  0x70   : > { %3039 = vmatpush3.msra.mxu0 %v3419_v6  ;;  %3027 = vmatprep.mubr.f32.mxu0 %v3549_v29 }
  0x71   : > { %3054 = vmatprep.subr.mxu0 %v3433_v11  ;;  %3063 = vmatpush3.msra.mxu1 %v3419_v6 }
  0x72   : > { %3051 = vmatprep.mubr.f32.mxu1 %v2108_v50  ;;  %3078 = vmatprep.subr.mxu1 %v3419_v6 }
  0x73   : > { %3028 = vmatmul.mubr.f32.gmra.mxu0 %v3554_v32  ;;  %3052 = vmatmul.mubr.f32.gmra.mxu1 %v2118_v51 }
  0x74   : > { %3040 = vmatprep.mubr.f32.mxu0 %v2092_v57  ;;  %3064 = vmatprep.mubr.f32.mxu1 %v2090_v52 }
  0x77   : > { %3041 = vmatmul.mubr.f32.vlgmr.msra.gmra.mxu0 %v2102_v59  ;;  %3065 = vmatmul.mubr.f32.vlgmr.msra.gmra.mxu1 %v2100_v49 }
  0x78   : > { %3055 = vmatpush3.msra.mxu0 %v3433_v11  ;;  %3043 = vmatprep.mubr.f32.mxu0 %v2112_v61 }
  0x79   : > { %3070 = vmatprep.subr.mxu0 %v3455_v24  ;;  %3079 = vmatpush3.msra.mxu1 %v3419_v6 }
  0x7a   : > { %3067 = vmatprep.mubr.f32.mxu1 %v2110_v54 }
  0x7b   : > { %3044 = vmatmul.mubr.f32.gmra.mxu0 %v2122_v62  ;;  %3068 = vmatmul.mubr.f32.gmra.mxu1 %v2120_v42 }
  0x7c   : > { %3056 = vmatprep.mubr.f32.mxu0 %v2089_v2  ;;  %3080 = vmatprep.mubr.f32.mxu1 %v3578_v47 }
  0x7f   : > { %3057 = vmatmul.mubr.f32.vlgmr.msra.gmra.mxu0 %v2099_v1  ;;  %3081 = vmatmul.mubr.f32.vlgmr.msra.gmra.mxu1 %v3584_v48 }
  0x80   : > { %3071 = vmatpush3.msra.mxu0 %v3455_v24  ;;  %3059 = vmatprep.mubr.f32.mxu0 %v2109_v55 }
  0x81   : > { %3083 = vmatprep.mubr.f32.mxu1 %v2108_v50 }
  0x83   : > { %3060 = vmatmul.mubr.f32.gmra.mxu0 %v2119_v53  ;;  %3084 = vmatmul.mubr.f32.gmra.mxu1 %v2118_v51 }
  0x84   : > { %3072 = vmatprep.mubr.f32.mxu0 %v3578_v47 }
  0x87   : > { %3073 = vmatmul.mubr.f32.vlgmr.msra.gmra.mxu0 %v3584_v48 }
  0x88   : > { %3075 = vmatprep.mubr.f32.mxu0 %v2108_v50 }
  0x8b   : > { %3076 = vmatmul.mubr.f32.gmra.mxu0 %v2118_v51 }
  0xe7   : > { %v2906_v6 = vpop.f32.mrf.mxu1 }
  0xe9   : > { %v422_v11 = vpop.f32.mrf.mxu1 }
  0xeb   : > { %v2909_v63 = vpop.f32.mrf.mxu1 }
  0xed   : > { %v434_v0 = vpop.f32.mrf.mxu1 }
  0xef   : > { %v2898_v3 = vpop.f32.mrf.mxu0  ;;  %v2922_v5 = vpop.f32.mrf.mxu1 }
  0xf0   : > { %v429_v23 = vadd.f32 %v2906_v6, %v2898_v3 }
  0xf1   : > { %v316_v8 = vpop.f32.mrf.mxu0  ;;  %v609_v9 = vpop.f32.mrf.mxu1 }
  0xf2   : > { %v423_v26 = vadd.f32 %v422_v11, %v316_v8 }
  0xf3   : > { %v2901_v10 = vpop.f32.mrf.mxu0  ;;  %v2925_v24 = vpop.f32.mrf.mxu1 }
  0xf4   : > { %v441_v30 = vadd.f32 %v2909_v63, %v2901_v10 }
  0xf5   : > { %v336_v12 = vpop.f32.mrf.mxu0  ;;  %v625_v13 = vpop.f32.mrf.mxu1 }
  0xf6   : > { %v435_v34 = vadd.f32 %v434_v0, %v336_v12 }
  0xf7   : > { %v2914_v14 = vpop.f32.mrf.mxu0  ;;  %v2938_v15 = vpop.f32.mrf.mxu1 }
  0xf8   : > { %v522_v27 = vadd.f32 %v2914_v14, %v429_v23 }
  0xf9   : > { %v514_v16 = vpop.f32.mrf.mxu0  ;;  %v797_v17 = vpop.f32.mrf.mxu1 }
  0xfa   : > { %v515_v31 = vadd.f32 %v514_v16, %v423_v26  ;;  %v618_v35 = vadd.f32 %v2922_v5, %v522_v27 }
  0xfb   : > { %v2917_v18 = vpop.f32.mrf.mxu0  ;;  %v2941_v19 = vpop.f32.mrf.mxu1 }
  0xfc   : > { %v536_v36 = vadd.f32 %v2917_v18, %v441_v30  ;;  %v610_v39 = vadd.f32 %v609_v9, %v515_v31 }
  0xfd   : > { %v528_v21 = vpop.f32.mrf.mxu0  ;;  %v809_v22 = vpop.f32.mrf.mxu1 }
  0xfe   : > { %v529_v7 = vadd.f32 %v528_v21, %v435_v34  ;;  %v634_v44 = vadd.f32 %v2925_v24, %v536_v36 }
  0xff   : > { %v2930_v20 = vpop.f32.mrf.mxu0  ;;  %v2954_v25 = vpop.f32.mrf.mxu1 }
 0x100   : > { %v714_v40 = vadd.f32 %v2930_v20, %v618_v35  ;;  %v626_v48 = vadd.f32 %v625_v13, %v529_v7 }
 0x101   : > { %v707_v28 = vpop.f32.mrf.mxu0  ;;  %v1009_v29 = vpop.f32.mrf.mxu1 }
 0x102   : > { %v708_v45 = vadd.f32 %v707_v28, %v610_v39  ;;  %v804_v2 = vadd.f32 %v2938_v15, %v714_v40 }
 0x103   : > { %v2933_v32 = vpop.f32.mrf.mxu0  ;;  %v2957_v33 = vpop.f32.mrf.mxu1 }
 0x104   : > { %v726_v50 = vadd.f32 %v2933_v32, %v634_v44  ;;  %v798_v52 = vadd.f32 %v797_v17, %v708_v45 }
 0x105   : > { %v719_v37 = vpop.f32.mrf.mxu0  ;;  %v1021_v38 = vpop.f32.mrf.mxu1 }
 0x106   : > { %v720_v55 = vadd.f32 %v719_v37, %v626_v48  ;;  %v816_v54 = vadd.f32 %v2941_v19, %v726_v50 }
 0x107   : > { %v2946_v41 = vpop.f32.mrf.mxu0  ;;  %v2970_v43 = vpop.f32.mrf.mxu1 }
 0x108   : > { %v914_v49 = vadd.f32 %v2946_v41, %v804_v2  ;;  %v810_v58 = vadd.f32 %v809_v22, %v720_v55 }
 0x109   : > { %v903_v46 = vpop.f32.mrf.mxu0  ;;  %v1196_v47 = vpop.f32.mrf.mxu1 }
 0x10a   : > { %v904_v56 = vadd.f32 %v903_v46, %v798_v52  ;;  %v1016_v59 = vadd.f32 %v2954_v25, %v914_v49 }
 0x10b   : > { %v2949_v1 = vpop.f32.mrf.mxu0  ;;  %v2973_v51 = vpop.f32.mrf.mxu1 }
 0x10c   : > { %v934_v60 = vadd.f32 %v2949_v1, %v816_v54  ;;  %v1010_v6 = vadd.f32 %v1009_v29, %v904_v56 }
 0x10d   : > { %v923_v53 = vpop.f32.mrf.mxu0  ;;  %v1212_v4 = vpop.f32.mrf.mxu1 }
 0x10e   : > { %v924_v11 = vadd.f32 %v923_v53, %v810_v58  ;;  %v1028_v5 = vadd.f32 %v2957_v33, %v934_v60 }
 0x10f   : > { %v2962_v42 = vpop.f32.mrf.mxu0  ;;  %v2986_v57 = vpop.f32.mrf.mxu1 }
 0x110   : > { %v1109_v63 = vadd.f32 %v2962_v42, %v1016_v59  ;;  %v1022_v24 = vadd.f32 %v1021_v38, %v924_v11 }
 0x111   : > { %v1101_v61 = vpop.f32.mrf.mxu0  ;;  %v1384_v62 = vpop.f32.mrf.mxu1 }
 0x112   : > { %v1102_v8 = vadd.f32 %v1101_v61, %v1010_v6  ;;  %v1205_v12 = vadd.f32 %v2970_v43, %v1109_v63 }
 0x113   : > { %v2965_v0 = vpop.f32.mrf.mxu0  ;;  %v2989_v3 = vpop.f32.mrf.mxu1 }
 0x114   : > { %v1123_v13 = vadd.f32 %v2965_v0, %v1028_v5  ;;  %v1197_v16 = vadd.f32 %v1196_v47, %v1102_v8 }
 0x115   : > { %v1115_v9 = vpop.f32.mrf.mxu0  ;;  %v1396_v10 = vpop.f32.mrf.mxu1 }
 0x116   : > { %v1116_v17 = vadd.f32 %v1115_v9, %v1022_v24  ;;  %v1221_v22 = vadd.f32 %v2973_v51, %v1123_v13 }
 0x117   : > { %v2978_v14 = vpop.f32.mrf.mxu0  ;;  %v3002_v15 = vpop.f32.mrf.mxu1 }
 0x118   : > { %v1301_v18 = vadd.f32 %v2978_v14, %v1205_v12  ;;  %v1213_v27 = vadd.f32 %v1212_v4, %v1116_v17 }
 0x119   : > { %v1294_v19 = vpop.f32.mrf.mxu0  ;;  %v1613_v21 = vpop.f32.mrf.mxu1 }
 0x11a   : > { %v1391_v23 = vadd.f32 %v2986_v57, %v1301_v18  ;;  %v1295_v20 = vadd.f32 %v1294_v19, %v1197_v16 }
 0x11b   : > { %v2981_v25 = vpop.f32.mrf.mxu0  ;;  %v3005_v26 = vpop.f32.mrf.mxu1 }
 0x11c   : > { %1408 = vst.msk [vmem:[%s3623_s19 + $0x8] sm:$0xff] %vm1406_vm1, %v1391_v23  ;;  %v1385_v28 = vadd.f32 %v1384_v62, %v1295_v20  ;;  %v1313_v29 = vadd.f32 %v2981_v25, %v1221_v22 }
 0x11d   : > { %v1306_v30 = vpop.f32.mrf.mxu0  ;;  %v1625_v31 = vpop.f32.mrf.mxu1 }
 0x11e   : > { %1407 = vst.msk [vmem:[%s3623_s19] sm:$0xff] %vm1406_vm1, %v1385_v28  ;;  %v1403_v32 = vadd.f32 %v2989_v3, %v1313_v29  ;;  %v1307_v33 = vadd.f32 %v1306_v30, %v1213_v27 }
 0x11f   : > { %v2994_v34 = vpop.f32.mrf.mxu0  ;;  %v3018_v35 = vpop.f32.mrf.mxu1 }
 0x120   : > { %1410 = vst.msk [vmem:[%s3623_s19 + $0x18] sm:$0xff] %vm1406_vm1, %v1403_v32  ;;  %v1397_v36 = vadd.f32 %v1396_v10, %v1307_v33  ;;  %v1620_v53 = vadd.f32 %v3002_v15, %v2994_v34 }
 0x121   : > { %v1507_v37 = vpop.f32.mrf.mxu0  ;;  %v1800_v38 = vpop.f32.mrf.mxu1 }
 0x122   : > { %1409 = vst.msk [vmem:[%s3623_s19 + $0x10] sm:$0xff] %vm1406_vm1, %v1397_v36  ;;  %v1614_v52 = vadd.f32 %v1613_v21, %v1507_v37 }
 0x123   : > { %v2997_v39 = vpop.f32.mrf.mxu0  ;;  %v3021_v7 = vpop.f32.mrf.mxu1 }
 0x124   : > { %v1632_v60 = vadd.f32 %v3005_v26, %v2997_v39 }
 0x125   : > { %v1527_v40 = vpop.f32.mrf.mxu0  ;;  %v1816_v41 = vpop.f32.mrf.mxu1 }
 0x126   : > { %v1626_v42 = vadd.f32 %v1625_v31, %v1527_v40 }
 0x127   : > { %v3010_v43 = vpop.f32.mrf.mxu0  ;;  %v3034_v44 = vpop.f32.mrf.mxu1 }
 0x128   : > { %v1713_v57 = vadd.f32 %v3010_v43, %v1620_v53 }
 0x129   : > { %v1705_v45 = vpop.f32.mrf.mxu0  ;;  %v1988_v46 = vpop.f32.mrf.mxu1 }
 0x12a   : > { %v1706_v4 = vadd.f32 %v1705_v45, %v1614_v52  ;;  %v1809_v63 = vadd.f32 %v3018_v35, %v1713_v57 }
 0x12b   : > { %v3013_v47 = vpop.f32.mrf.mxu0  ;;  %v3037_v48 = vpop.f32.mrf.mxu1 }
 0x12c   : > { %v1801_v61 = vadd.f32 %v1800_v38, %v1706_v4  ;;  %v1727_v0 = vadd.f32 %v3013_v47, %v1632_v60 }
 0x12d   : > { %v1719_v2 = vpop.f32.mrf.mxu0  ;;  %v2000_v50 = vpop.f32.mrf.mxu1 }
 0x12e   : > { %v1720_v62 = vadd.f32 %v1719_v2, %v1626_v42  ;;  %v1825_v13 = vadd.f32 %v3021_v7, %v1727_v0 }
 0x12f   : > { %v3026_v1 = vpop.f32.mrf.mxu0  ;;  %v3050_v51 = vpop.f32.mrf.mxu1 }
 0x130   : > { %v1817_v9 = vadd.f32 %v1816_v41, %v1720_v62  ;;  %v1905_v10 = vadd.f32 %v3026_v1, %v1809_v63 }
 0x131   : > { %v1898_v55 = vpop.f32.mrf.mxu0  ;;  %v2200_v49 = vpop.f32.mrf.mxu1 }
 0x132   : > { %v1899_v3 = vadd.f32 %v1898_v55, %v1801_v61  ;;  %v1995_v17 = vadd.f32 %v3034_v44, %v1905_v10 }
 0x133   : > { %v3029_v54 = vpop.f32.mrf.mxu0  ;;  %v3053_v56 = vpop.f32.mrf.mxu1 }
 0x134   : > { %v1989_v14 = vadd.f32 %v1988_v46, %v1899_v3  ;;  %v1917_v18 = vadd.f32 %v3029_v54, %v1825_v13 }
 0x135   : > { %v1910_v58 = vpop.f32.mrf.mxu0  ;;  %v2212_v59 = vpop.f32.mrf.mxu1 }
 0x136   : > { %v1911_v15 = vadd.f32 %v1910_v58, %v1817_v9  ;;  %v2007_v26 = vadd.f32 %v3037_v48, %v1917_v18 }
 0x137   : > { %v3042_v6 = vpop.f32.mrf.mxu0  ;;  %v3066_v11 = vpop.f32.mrf.mxu1 }
 0x138   : > { %v2001_v23 = vadd.f32 %v2000_v50, %v1911_v15  ;;  %v2105_v20 = vadd.f32 %v3042_v6, %v1995_v17 }
 0x139   : > { %v2094_v5 = vpop.f32.mrf.mxu0  ;;  %v2387_v8 = vpop.f32.mrf.mxu1 }
 0x13a   : > { %v2095_v19 = vadd.f32 %v2094_v5, %v1989_v14  ;;  %v2207_v31 = vadd.f32 %v3050_v51, %v2105_v20 }
 0x13b   : > { %v3045_v24 = vpop.f32.mrf.mxu0  ;;  %v3069_v12 = vpop.f32.mrf.mxu1 }
 0x13c   : > { %v2201_v27 = vadd.f32 %v2200_v49, %v2095_v19  ;;  %v2125_v32 = vadd.f32 %v3045_v24, %v2007_v26 }
 0x13d   : > { %v2114_v16 = vpop.f32.mrf.mxu0  ;;  %v2403_v22 = vpop.f32.mrf.mxu1 }
 0x13e   : > { %v2115_v28 = vadd.f32 %v2114_v16, %v2001_v23  ;;  %v2219_v39 = vadd.f32 %v3053_v56, %v2125_v32 }
 0x13f   : > { %v3058_v21 = vpop.f32.mrf.mxu0  ;;  %v3082_v30 = vpop.f32.mrf.mxu1 }
 0x140   : > { %v2213_v35 = vadd.f32 %v2212_v59, %v2115_v28  ;;  %v2300_v36 = vadd.f32 %v3058_v21, %v2207_v31 }
 0x141   : > { %v2292_v25 = vpop.f32.mrf.mxu0  ;;  %v2575_v38 = vpop.f32.mrf.mxu1 }
 0x142   : > { %v2293_v33 = vadd.f32 %v2292_v25, %v2201_v27  ;;  %v2396_v43 = vadd.f32 %v3066_v11, %v2300_v36 }
 0x143   : > { %v3061_v29 = vpop.f32.mrf.mxu0  ;;  %v3085_v47 = vpop.f32.mrf.mxu1 }
 0x144   : > { %v2388_v7 = vadd.f32 %v2387_v8, %v2293_v33  ;;  %v2314_v44 = vadd.f32 %v3061_v29, %v2219_v39 }
 0x145   : > { %v2306_v34 = vpop.f32.mrf.mxu0  ;;  %v2587_v55 = vpop.f32.mrf.mxu1 }
 0x146   : > { %v2307_v40 = vadd.f32 %v2306_v34, %v2213_v35  ;;  %v2412_v51 = vadd.f32 %v3069_v12, %v2314_v44 }
 0x147   : > { %v3074_v37 = vpop.f32.mrf.mxu0 }
 0x148   : > { %v2404_v48 = vadd.f32 %v2403_v22, %v2307_v40  ;;  %v2492_v2 = vadd.f32 %v3074_v37, %v2396_v43 }
 0x149   : > { %v2485_v41 = vpop.f32.mrf.mxu0 }
 0x14a   : > { %v2486_v45 = vadd.f32 %v2485_v41, %v2388_v7  ;;  %v2582_v49 = vadd.f32 %v3082_v30, %v2492_v2 }
 0x14b   : > { %v3077_v46 = vpop.f32.mrf.mxu0 }
 0x14c   : > { %v2576_v50 = vadd.f32 %v2575_v38, %v2486_v45  ;;  %v2504_v53 = vadd.f32 %v3077_v46, %v2412_v51 }
 0x14d   : > { %v2497_v1 = vpop.f32.mrf.mxu0 }
 0x14e   : > { %v2498_v52 = vadd.f32 %v2497_v1, %v2404_v48  ;;  %2601 = vrot.lane.b32.xlu0 %v2576_v50, %s3287_s27  ;;  %v2594_v54 = vadd.f32 %v3085_v47, %v2504_v53 }
 0x150   : > { %v2588_v4 = vadd.f32 %v2587_v55, %v2498_v52 }
 0x152   : > { %2603 = vrot.lane.b32.xlu0 %v2582_v49, %s3287_s27  ;;  %2605 = vrot.lane.b32.xlu1 %v2588_v4, %s3287_s27 }
 0x156   : > { %2607 = vrot.lane.b32.xlu1 %v2594_v54, %s3287_s27  ;;  %s3181_s27 = sshll.u32 %s3288_s14, 4  ;;  %s3182_s27 = int_to_ptr.vmem [resolvable:$false] %s3181_s27 }
 0x157   : > { %s3183_s28 = scalar_lea.vmem %s3182_s27, 1024  ;;  %p3184_p6 = scmp.lt.s32.totalorder %s3645_s6, %s3182_s27 }
 0x158   : > { %p3185_p8 = scmp.lt.s32.totalorder %s3183_s28, %s3177_s13 }
 0x15a   : > { %p3186_p9 = por %p3185_p8, %p3184_p6 }
 0x15c   : > { %p3187_p10 = pnand %p3186_p9, %p3180_p4 }
 0x1c0   : > { %v2602_v56 = vpop.permute.xlu0 %2601 }
 0x1c1   : > { %2614 = vst.msk [vmem:[%s3623_s19] sm:$0xff] %vm2613_vm2, %v2602_v56 }
 0x1c4   : > { %v2604_v42 = vpop.permute.xlu0 %2603  ;;  %v2606_v57 = vpop.permute.xlu1 %2605 }
 0x1c5   : > { %2615 = vst.msk [vmem:[%s3623_s19 + $0x8] sm:$0xff] %vm2613_vm2, %v2604_v42  ;;  %2616 = vst.msk [vmem:[%s3623_s19 + $0x10] sm:$0xff] %vm2613_vm2, %v2606_v57 }
 0x1c8   : > { %v2608_v58 = vpop.permute.xlu1 %2607 }
 0x1c9   : > { %2617 = vst.msk [vmem:[%s3623_s19 + $0x18] sm:$0xff] %vm2613_vm2, %v2608_v58 }
 0x1ca   : > { %3190 = shalt.err (!%p3187_p10)
}
 0x1cb   : > { %s3191_s7 = scalar_lea.hbm %s3643_s8, 512  ;;  %s3195_s30 = scalar_lea.hbm %s3709_s2, 4096 }
 0x1cc   : > { %p3192_p11 = scmp.ne.s32.totalorder %s3643_s8, %s3191_s7  ;;  %p3196_p0 = scmp.lt.s32.totalorder %s3643_s8, %s3709_s2 }
 0x1cd   : > { %p3197_p1 = scmp.lt.s32.totalorder %s3195_s30, %s3191_s7 }
 0x1ce   : > { %p3193_p12 = pnand %p3192_p11, %p3369_p5 }
 0x1cf   : > { %p3198_p2 = por %p3197_p1, %p3196_p0 }
 0x1d0   : > { %p3194_p13 = pneg %p3193_p12 }
 0x1d2   : > { %p3199_p3 = pnand %p3198_p2, %p3194_p13 }
 0x1d4   : > { %3202 = shalt.err (!%p3199_p3)
}
 0x1d5   : > { %s3289_s22 = smov 128   ;;  %s3290_s26 = smov 256  }
 0x1d6   : > { %s3291_s13 = smov 8  }
 0x1d7   : > { %3086 = dma.vmem_to_hbm [thread:$0]  (%p3369_p5), %s3645_s6, 512, %s3643_s8, %s3650_s12, %s3289_s22, %s3290_s26, %s3291_s13  }
 0x1d8 PF: > { %p3092_p4 = scmp.ge.s32.totalorder %s3285_s18, 2  ;;  %s2653_s14 = sand.u32 1, %s3249_s9  }
 0x1d9   : > { %s2654_s27 = scalar_lea.sflag [#allocation3], %s2653_s14 }
 0x1da   : > { %p3089_p6 = pnand %p3092_p4, %p3376_p7 }
 0x1dc   : > { %p3090_p8 = pneg %p3089_p6 }
 0x1de   : > { %3244 = dma.done.wait (%p3090_p8), %s2654_s27, 512  }
 0x1df   : > { %3246 = vsyncadd (%p3090_p8), %s2654_s27, 4294966784  ;;  %s15_s18 = sadd.s32 1, %s3285_s18   ;;  %s3712_s9 = smov %s3253_s10 }
 0x1e0   : > { %p12_p9 = scmp.ge.s32.totalorder %s15_s18, 10   ;;  %s3713_s10 = smov %s3257_s11 }
 0x1e1   : > { %s3714_s11 = smov %s3392_s4  ;;  %s3715_s12 = smov %s3273_s15 }
 0x1e2   : > { %s3716_s13 = smov %s3277_s16  ;;  %s3717_s14 = smov %s3281_s17 }
 0x1e3   : > { %s3718_s15 = smov %s3722_s20  ;;  %s3719_s16 = smov %s3726_s21 }
 0x1e4   : > { %s3720_s17 = smov %s3730_s23  ;;  %14 = sbr.rel (!%p12_p9) target bundleno = 6 (0x6), region = 67 }
 0x1e9   :  { %2659 = vsyncpa [#allocation3], 1 }
 0x1ea   :  { %2661 = vsyncpa [#allocation3 + $0x1], 1 }

// kernel: tpu_custom_call.1
= control target key start
LH: loop header
LB: loop body
LE: loop exit
PB: predicated region body
PF: predicated region fallthrough
CT: control target
= control target key end

     0   :  { %7 = vsyncpa [#allocation3], 0  ;;  %s3707_s0 = inlined_call_operand.vmem [shape: f32[2,2,2,4,32,8], index: 0, kind: input, shape index: {}]   ;;  %s3708_s1 = inlined_call_operand.vmem [shape: f32[2,8,16], index: 1, kind: input, shape index: {}]   ;;  %s3709_s2 = inlined_call_operand.hbm [shape: f32[2,2,4,2,8,32], index: 2, kind: output, shape index: {}]  }
   0x1   :  { %9 = vsyncpa [#allocation3 + $0x1], 0  ;;  %s3307_s9 = smov 0   ;;  %s3309_s10 = smov 0  }
   0x2   :  { %s3311_s11 = smov 0   ;;  %s3313_s12 = smov 0  }
   0x3   :  { %s3315_s13 = smov 0   ;;  %s3317_s14 = smov 0  }
   0x4   :  { %s3319_s15 = smov 0   ;;  %s3321_s16 = smov 0  }
   0x5   :  { %s3323_s17 = smov 0   ;;  %s3325_s18 = smov 0  }
   0x6 LB: > { %s2744_s19 = sadd.s32 4294967295, %s3285_s18   ;;  %s33_s20 = sadd.s32 1, %s3273_s15  ;;  %s3285_s18 = sphi %s3325_s18, %s15_s18   ;;  %s3281_s17 = sphi %s3323_s17, %s3720_s17   ;;  %s3277_s16 = sphi %s3321_s16, %s3719_s16   ;;  %s3273_s15 = sphi %s3319_s15, %s3718_s15   ;;  %s3269_s14 = sphi %s3317_s14, %s3717_s14   ;;  %s3265_s13 = sphi %s3315_s13, %s3716_s13   ;;  %s3261_s12 = sphi %s3313_s12, %s3715_s12   ;;  %s3257_s11 = sphi %s3311_s11, %s3714_s11   ;;  %s3253_s10 = sphi %s3309_s10, %s3713_s10   ;;  %s3249_s9 = sphi %s3307_s9, %s3712_s9  }
   0x7   : > { %p35_p0 = scmp.ge.s32.totalorder %s33_s20, 2  ;;  %s37_s21 = sadd.s32 1, %s3277_s16 }
   0x8   : > { %s2745_s22 = sadd.s32 4294967294, %s3285_s18   ;;  %p117_p1 = scmp.ne.s32.totalorder %s3257_s11, %s3253_s10 }
   0x9   : > { %s3722_s20 = smov (%p35_p0, %s33_s20), 0  ;;  %s3724_s21 = smov (!%p35_p0, %s37_s21), %s3277_s16 }
   0xa   : > { %s41_s23 = sadd.s32 1, %s3281_s17  ;;  %p118_p2 = scmp.eq.s32.totalorder %s2744_s19, 7 }
   0xb   : > { %p39_p3 = scmp.ge.s32.totalorder %s3724_s21, 2  ;;  %p123_p4 = scmp.ne.s32.totalorder %s3253_s10, %s3249_s9 }
   0xc   : > { %p3369_p5 = por %p118_p2, %p117_p1  ;;  %p124_p6 = scmp.eq.s32.totalorder %s2745_s22, 7 }
   0xd   : > { %s3726_s21 = smov (%p39_p3, %s3724_s21), 0  ;;  %s3728_s23 = smov (!%p39_p3, %s41_s23), %s3281_s17 }
   0xe   : > { %p3376_p7 = por %p124_p6, %p123_p4  ;;  %p43_p8 = scmp.ge.s32.totalorder %s3728_s23, 2 }
   0xf   : > { %p2748_p9 = scmp.ge.s32.totalorder %s3285_s18, 1  ;;  %s99_s26 = ssub.s32 %s3277_s16, %s3726_s21 }
  0x10   : > { %p166_p10 = scmp.lt.s32.totalorder %s3285_s18, 9  ;;  %s3730_s23 = smov (%p43_p8, %s3728_s23), 0 }
  0x11   : > { %s103_s27 = ssub.s32 %s3273_s15, %s3722_s20  ;;  %s98_s28 = ssub.s32 %s3281_s17, %s3730_s23 }
  0x12   : > { %p167_p11 = pnand %p2748_p9, %p166_p10  ;;  %s100_s29 = sor.u32 %s99_s26, %s98_s28 }
  0x13   : > { %s104_s30 = sor.u32 %s103_s27, %s100_s29  ;;  %s107_s3 = sadd.s32 1, %s3257_s11 }
  0x14   : > { %p105_p12 = scmp.eq.s32.totalorder %s104_s30, 0  ;;  %170 = sbr.rel (%p167_p11) target bundleno = 472 (0x1d8), region = 28 }
  0x15   : > { %p201_p13 = scmp.lt.s32.totalorder (!%p167_p11), %s3269_s14, 1  ;;  %p203_p0 = scmp.lt.s32.totalorder (!%p167_p11), %s3265_s13, 1 }
  0x16   : > { %s3392_s4 = scalar_select %p105_p12, %s3257_s11, %s107_s3  }
  0x17   : > { %p205_p1 = scmp.lt.s32.totalorder (!%p167_p11), %s3261_s12, 1 }
  0x19   : > { %v2758_v0 = vld [vmem:[%s3708_s1 + $0x8] sm:$0xff]  ;;  %s202_s7 = scalar_select %p201_p13, %s3269_s14, 1  ;;  %v223_v3 = vld [vmem:[%s3708_s1] sm:$0xff]  ;;  %vm231_vm0 = vcmask 64512   ;;  %vm1406_vm1 = vcmask 130048   ;;  %vm2613_vm2 = vcmask 261248  }
  0x1a   : > { %v3399_v1 = vand.u32 4294901760, %v2758_v0  ;;  %s204_s8 = scalar_select %p203_p0, %s3265_s13, 1  ;;  %v3419_v6 = vand.u32 4294901760, %v223_v3 }
  0x1b   : > { %s206_s19 = scalar_select %p205_p1, %s3261_s12, 1 }
  0x1c   : > { %2894 = vmatprep.subr.mxu0 %v3399_v1  ;;  %v3405_v2 = vsub.f32 %v2758_v0, %v3399_v1  ;;  %s2751_s27 = sshll.u32 %s204_s8, 5  ;;  %s2752_s28 = sshll.u32 %s202_s7, 6  ;;  %v3433_v11 = vsub.f32 %v223_v3, %v3419_v6 }
  0x1d   : > { %2895 = vmatpush3.msra.mxu0 %v3399_v1  ;;  %s2750_s29 = sshll.u32 %s206_s19, 4  ;;  %s197_s7 = sand.u32 1, %s3253_s10  }
  0x1e   : > { %v3414_v4 = vand.u32 4294901760, %v3405_v2  ;;  %2910 = vmatprep.subr.mxu0 %v3405_v2  ;;  %s212_s30 = sadd.s32 %s2751_s27, %s2750_s29  ;;  %v3455_v24 = vand.u32 4294901760, %v3433_v11  ;;  %s2749_s8 = sshll.u32 %s197_s7, 5 }
  0x1f   : > { %s214_s3 = sadd.s32 %s2752_s28, %s212_s30  ;;  %s3623_s19 = scalar_lea.vmem [#allocation2], %s2749_s8 }
  0x20   : > { %v384_v5 = vsub.f32 %v3405_v2, %v3414_v4  ;;  %s2753_s5 = sshll.u32 %s214_s3, 3  ;;  %v971_v33 = vsub.f32 %v3433_v11, %v3455_v24  ;;  %s3287_s27 = smov 16  }
  0x21   : > { %s3426_s26 = scalar_lea.vmem %s3707_s0, %s2753_s5  ;;  %s2769_s28 = sshll.u32 %s3265_s13, 3 }
  0x22   : > { %v3421_v7 = vand.u32 4294901760, %v384_v5  ;;  %v2754_v8 = vld [vmem:[%s3426_s26 + $0x20] sm:$0xff]  ;;  %v2755_v9 = vld [vmem:[%s3426_s26 + $0x28] sm:$0xff]  ;;  %v2756_v10 = vld [vmem:[%s3426_s26 + $0x30] sm:$0xff]  ;;  %v3473_v42 = vand.u32 4294901760, %v971_v33  ;;  %s2633_s29 = sadd.s32 %s3261_s12, %s2769_s28  ;;  %s2770_s30 = sshll.u32 %s3269_s14, 4 }
  0x23   : > { %v233_v12 = vsel %vm231_vm0, %v2754_v8, 0  ;;  %v236_v13 = vsel %vm231_vm0, %v2755_v9, 0  ;;  %v239_v14 = vsel %vm231_vm0, %v2756_v10, 0  ;;  %v2757_v15 = vld [vmem:[%s3426_s26 + $0x38] sm:$0xff]  ;;  %v219_v34 = vld [vmem:[%s3426_s26] sm:$0xff]  ;;  %v220_v40 = vld [vmem:[%s3426_s26 + $0x8] sm:$0xff]  ;;  %s2635_s3 = sadd.s32 %s2770_s30, %s2633_s29 }
  0x24   : > { %2902 = vmatprep.subr.mxu1 %v3421_v7  ;;  %v3440_v16 = vand.u32 4294901760, %v233_v12  ;;  %v3442_v17 = vand.u32 4294901760, %v236_v13  ;;  %v3445_v18 = vand.u32 4294901760, %v239_v14  ;;  %v242_v19 = vsel %vm231_vm0, %v2757_v15, 0  ;;  %v2759_v41 = vld [vmem:[%s3426_s26 + $0x40] sm:$0xff]  ;;  %v221_v43 = vld [vmem:[%s3426_s26 + $0x10] sm:$0xff] }
  0x25   : > { %2903 = vmatpush3.msra.mxu1 %v3421_v7  ;;  %v3448_v20 = vand.u32 4294901760, %v242_v19  ;;  %v820_v39 = vsel %vm231_vm0, %v219_v34, 0  ;;  %v2760_v45 = vld [vmem:[%s3426_s26 + $0x48] sm:$0xff]  ;;  %v2761_v46 = vld [vmem:[%s3426_s26 + $0x50] sm:$0xff]  ;;  %v823_v48 = vsel %vm231_vm0, %v220_v40, 0  ;;  %v3483_v49 = vsel %vm231_vm0, %v2759_v41, 0 }
  0x26   : > { %2918 = vmatprep.subr.mxu1 %v3399_v1  ;;  %v311_v21 = vsub.f32 %v233_v12, %v3440_v16  ;;  %2904 = vmatprep.mubr.f32.mxu1 %v3440_v16  ;;  %v321_v22 = vsub.f32 %v236_v13, %v3442_v17  ;;  %v331_v23 = vsub.f32 %v239_v14, %v3445_v18  ;;  %v3479_v47 = vand.u32 4294901760, %v820_v39  ;;  %v222_v51 = vld [vmem:[%s3426_s26 + $0x18] sm:$0xff]  ;;  %v2763_v14 = vld [vmem:[%s3426_s26 + $0x60] sm:$0xff]  ;;  %s2771_s5 = sshll.u32 %s2635_s3, 7  ;;  %s2638_s6 = sshll.u32 %s3623_s19, 4  ;;  %s3645_s6 = int_to_ptr.vmem [resolvable:$true] %s2638_s6 }
  0x27   : > { %2905 = vmatmul.mubr.f32.vlgmr.msra.gmra.mxu1 %v3442_v17  ;;  %v3459_v25 = vsub.f32 %v242_v19, %v3448_v20  ;;  %v826_v50 = vsel %vm231_vm0, %v221_v43, 0  ;;  %v2762_v52 = vld [vmem:[%s3426_s26 + $0x58] sm:$0xff]  ;;  %v3492_v53 = vsel %vm231_vm0, %v2760_v45, 0  ;;  %v3495_v54 = vsel %vm231_vm0, %v2761_v46, 0  ;;  %v2764_v19 = vld [vmem:[%s3426_s26 + $0x68] sm:$0xff]  ;;  %s3643_s8 = scalar_lea.hbm %s3709_s2, %s2771_s5  ;;  %s3650_s12 = scalar_lea.sflag [#allocation3], %s197_s7 }
  0x28   : > { %v312_v26 = vand.u32 4294901760, %v311_v21  ;;  %v322_v27 = vand.u32 4294901760, %v321_v22  ;;  %2919 = vmatpush3.msra.mxu1 %v3399_v1  ;;  %v332_v28 = vand.u32 4294901760, %v331_v23  ;;  %2907 = vmatprep.mubr.f32.mxu1 %v3445_v18  ;;  %v3497_v55 = vand.u32 4294901760, %v823_v48  ;;  %s3177_s13 = scalar_lea.vmem %s3645_s6, 512  ;;  %s3288_s14 = smov [#allocation2]  }
  0x29   : > { %v342_v29 = vand.u32 4294901760, %v3459_v25  ;;  %2934 = vmatprep.subr.mxu1 %v3399_v1  ;;  %v898_v56 = vsub.f32 %v820_v39, %v3479_v47  ;;  %v3501_v57 = vand.u32 4294901760, %v826_v50  ;;  %v829_v58 = vsel %vm231_vm0, %v222_v51, 0  ;;  %p3178_p2 = scmp.ne.s32.totalorder %s3645_s6, %s3177_s13 }
  0x2a   : > { %v313_v30 = vsub.f32 %v311_v21, %v312_v26  ;;  %v323_v31 = vsub.f32 %v321_v22, %v322_v27  ;;  %v333_v32 = vsub.f32 %v331_v23, %v332_v28  ;;  %v3505_v59 = vsel %vm231_vm0, %v2762_v52, 0 }
  0x2b   : > { %v343_v35 = vsub.f32 %v3459_v25, %v342_v29  ;;  %2908 = vmatmul.mubr.f32.gmra.mxu1 %v3448_v20  ;;  %v908_v60 = vsub.f32 %v823_v48, %v3497_v55  ;;  %v3509_v61 = vand.u32 4294901760, %v829_v58  ;;  %v899_v62 = vand.u32 4294901760, %v898_v56  ;;  %p3179_p3 = pnand %p3178_p2, %p3369_p5 }
  0x2c   : > { %v314_v36 = vand.u32 4294901760, %v313_v30  ;;  %v324_v37 = vand.u32 4294901760, %v323_v31  ;;  %v334_v38 = vand.u32 4294901760, %v333_v32  ;;  %2920 = vmatprep.mubr.f32.mxu1 %v312_v26  ;;  %v918_v63 = vsub.f32 %v826_v50, %v3501_v57  ;;  %v2766_v26 = vld [vmem:[%s3426_s26 + $0x78] sm:$0xff] }
  0x2d   : > { %v344_v44 = vand.u32 4294901760, %v343_v35  ;;  %v909_v0 = vand.u32 4294901760, %v908_v60  ;;  %v928_v3 = vsub.f32 %v829_v58, %v3509_v61  ;;  %v900_v5 = vsub.f32 %v898_v56, %v899_v62  ;;  %p3180_p4 = pneg %p3179_p3 }
  0x2e   : > { %2896 = vmatprep.mubr.f32.mxu0 %v314_v36  ;;  %v919_v8 = vand.u32 4294901760, %v918_v63  ;;  %v1433_v30 = vsel %vm231_vm0, %v2766_v26, 0  ;;  %v3584_v48 = vand.u32 4294901760, %v3492_v53  ;;  %v2108_v50 = vand.u32 4294901760, %v3495_v54 }
  0x2f   : > { %2897 = vmatmul.mubr.f32.vlgmr.msra.gmra.mxu0 %v324_v37  ;;  %2921 = vmatmul.mubr.f32.vlgmr.msra.gmra.mxu1 %v322_v27  ;;  %v910_v9 = vsub.f32 %v908_v60, %v909_v0  ;;  %v929_v10 = vand.u32 4294901760, %v928_v3  ;;  %v901_v12 = vand.u32 4294901760, %v900_v5  ;;  %v3554_v32 = vand.u32 4294901760, %v1433_v30 }
  0x30   : > { %2911 = vmatpush3.msra.mxu0 %v3405_v2  ;;  %2899 = vmatprep.mubr.f32.mxu0 %v334_v38  ;;  %v920_v13 = vsub.f32 %v918_v63, %v919_v8  ;;  %v2118_v51 = vand.u32 4294901760, %v3505_v59 }
  0x31   : > { %2926 = vmatprep.subr.mxu0 %v3414_v4  ;;  %2935 = vmatpush3.msra.mxu1 %v3399_v1  ;;  %v911_v15 = vand.u32 4294901760, %v910_v9  ;;  %v1532_v36 = vsub.f32 %v1433_v30, %v3554_v32 }
  0x32   : > { %2923 = vmatprep.mubr.f32.mxu1 %v332_v28  ;;  %2950 = vmatprep.subr.mxu1 %v3473_v42 }
  0x33   : > { %2900 = vmatmul.mubr.f32.gmra.mxu0 %v344_v44  ;;  %2924 = vmatmul.mubr.f32.gmra.mxu1 %v342_v29 }
  0x34   : > { %2912 = vmatprep.mubr.f32.mxu0 %v311_v21  ;;  %2936 = vmatprep.mubr.f32.mxu1 %v3440_v16  ;;  %v2765_v21 = vld [vmem:[%s3426_s26 + $0x70] sm:$0xff] }
  0x37   : > { %2913 = vmatmul.mubr.f32.vlgmr.msra.gmra.mxu0 %v321_v22  ;;  %2937 = vmatmul.mubr.f32.vlgmr.msra.gmra.mxu1 %v3442_v17 }
  0x38   : > { %2927 = vmatpush3.msra.mxu0 %v3414_v4  ;;  %2915 = vmatprep.mubr.f32.mxu0 %v331_v23 }
  0x39   : > { %2942 = vmatprep.subr.mxu0 %v3419_v6  ;;  %2951 = vmatpush3.msra.mxu1 %v3473_v42 }
  0x3a   : > { %2939 = vmatprep.mubr.f32.mxu1 %v3445_v18  ;;  %2966 = vmatprep.subr.mxu1 %v3419_v6 }
  0x3b   : > { %2916 = vmatmul.mubr.f32.gmra.mxu0 %v3459_v25  ;;  %2940 = vmatmul.mubr.f32.gmra.mxu1 %v3448_v20  ;;  %v1430_v25 = vsel %vm231_vm0, %v2765_v21, 0 }
  0x3c   : > { %2928 = vmatprep.mubr.f32.mxu0 %v3440_v16  ;;  %2952 = vmatprep.mubr.f32.mxu1 %v3479_v47  ;;  %v930_v16 = vsub.f32 %v928_v3, %v929_v10  ;;  %v3549_v29 = vand.u32 4294901760, %v1430_v25 }
  0x3e   : > { %v931_v22 = vand.u32 4294901760, %v930_v16  ;;  %v1522_v34 = vsub.f32 %v1430_v25, %v3549_v29 }
  0x3f   : > { %2929 = vmatmul.mubr.f32.vlgmr.msra.gmra.mxu0 %v3442_v17  ;;  %2953 = vmatmul.mubr.f32.vlgmr.msra.gmra.mxu1 %v3497_v55  ;;  %v921_v17 = vand.u32 4294901760, %v920_v13 }
  0x40   : > { %2943 = vmatpush3.msra.mxu0 %v3419_v6  ;;  %2931 = vmatprep.mubr.f32.mxu0 %v3445_v18  ;;  %v1424_v18 = vsel %vm231_vm0, %v2763_v14, 0  ;;  %v1523_v38 = vand.u32 4294901760, %v1522_v34 }
  0x41   : > { %2958 = vmatprep.subr.mxu0 %v3433_v11  ;;  %2967 = vmatpush3.msra.mxu1 %v3419_v6  ;;  %v3537_v23 = vand.u32 4294901760, %v1424_v18 }
  0x42   : > { %2955 = vmatprep.mubr.f32.mxu1 %v3501_v57  ;;  %2982 = vmatprep.subr.mxu1 %v3419_v6  ;;  %v1524_v41 = vsub.f32 %v1522_v34, %v1523_v38 }
  0x43   : > { %2932 = vmatmul.mubr.f32.gmra.mxu0 %v3448_v20  ;;  %2956 = vmatmul.mubr.f32.gmra.mxu1 %v3509_v61  ;;  %v1427_v20 = vsel %vm231_vm0, %v2764_v19, 0  ;;  %v1502_v28 = vsub.f32 %v1424_v18, %v3537_v23 }
  0x44   : > { %2944 = vmatprep.mubr.f32.mxu0 %v901_v12  ;;  %2968 = vmatprep.mubr.f32.mxu1 %v899_v62  ;;  %v3545_v27 = vand.u32 4294901760, %v1427_v20  ;;  %v1525_v45 = vand.u32 4294901760, %v1524_v41 }
  0x45   : > { %v1503_v33 = vand.u32 4294901760, %v1502_v28 }
  0x46   : > { %v1512_v31 = vsub.f32 %v1427_v20, %v3545_v27 }
  0x47   : > { %2945 = vmatmul.mubr.f32.vlgmr.msra.gmra.mxu0 %v911_v15  ;;  %2969 = vmatmul.mubr.f32.vlgmr.msra.gmra.mxu1 %v909_v0  ;;  %v1504_v37 = vsub.f32 %v1502_v28, %v1503_v33 }
  0x48   : > { %2959 = vmatpush3.msra.mxu0 %v3433_v11  ;;  %2947 = vmatprep.mubr.f32.mxu0 %v921_v17  ;;  %v1513_v35 = vand.u32 4294901760, %v1512_v31 }
  0x49   : > { %2974 = vmatprep.subr.mxu0 %v3455_v24  ;;  %2983 = vmatpush3.msra.mxu1 %v3419_v6  ;;  %v1505_v40 = vand.u32 4294901760, %v1504_v37 }
  0x4a   : > { %2971 = vmatprep.mubr.f32.mxu1 %v919_v8  ;;  %2998 = vmatprep.subr.mxu1 %v3421_v7  ;;  %v1514_v39 = vsub.f32 %v1512_v31, %v1513_v35 }
  0x4b   : > { %2948 = vmatmul.mubr.f32.gmra.mxu0 %v931_v22  ;;  %2972 = vmatmul.mubr.f32.gmra.mxu1 %v929_v10 }
  0x4c   : > { %2960 = vmatprep.mubr.f32.mxu0 %v898_v56  ;;  %2984 = vmatprep.mubr.f32.mxu1 %v3479_v47  ;;  %v1515_v43 = vand.u32 4294901760, %v1514_v39 }
  0x4f   : > { %2961 = vmatmul.mubr.f32.vlgmr.msra.gmra.mxu0 %v908_v60  ;;  %2985 = vmatmul.mubr.f32.vlgmr.msra.gmra.mxu1 %v3497_v55 }
  0x50   : > { %2975 = vmatpush3.msra.mxu0 %v3455_v24  ;;  %2963 = vmatprep.mubr.f32.mxu0 %v918_v63 }
  0x51   : > { %2990 = vmatprep.subr.mxu0 %v3399_v1  ;;  %2999 = vmatpush3.msra.mxu1 %v3421_v7  ;;  %v1533_v7 = vand.u32 4294901760, %v1532_v36 }
  0x52   : > { %2987 = vmatprep.mubr.f32.mxu1 %v3501_v57  ;;  %3014 = vmatprep.subr.mxu1 %v3399_v1 }
  0x53   : > { %2964 = vmatmul.mubr.f32.gmra.mxu0 %v928_v3  ;;  %2988 = vmatmul.mubr.f32.gmra.mxu1 %v3509_v61  ;;  %v1534_v44 = vsub.f32 %v1532_v36, %v1533_v7 }
  0x54   : > { %2976 = vmatprep.mubr.f32.mxu0 %v3479_v47  ;;  %3000 = vmatprep.mubr.f32.mxu1 %v3537_v23  ;;  %v3578_v47 = vand.u32 4294901760, %v3483_v49 }
  0x55   : > { %v1535_v46 = vand.u32 4294901760, %v1534_v44 }
  0x57   : > { %2977 = vmatmul.mubr.f32.vlgmr.msra.gmra.mxu0 %v3497_v55  ;;  %3001 = vmatmul.mubr.f32.vlgmr.msra.gmra.mxu1 %v3545_v27  ;;  %v2109_v55 = vsub.f32 %v3495_v54, %v2108_v50 }
  0x58   : > { %2991 = vmatpush3.msra.mxu0 %v3399_v1  ;;  %2979 = vmatprep.mubr.f32.mxu0 %v3501_v57 }
  0x59   : > { %3006 = vmatprep.subr.mxu0 %v3405_v2  ;;  %3015 = vmatpush3.msra.mxu1 %v3399_v1  ;;  %v2110_v54 = vand.u32 4294901760, %v2109_v55 }
  0x5a   : > { %3003 = vmatprep.mubr.f32.mxu1 %v3549_v29  ;;  %3030 = vmatprep.subr.mxu1 %v3399_v1 }
  0x5b   : > { %2980 = vmatmul.mubr.f32.gmra.mxu0 %v3509_v61  ;;  %3004 = vmatmul.mubr.f32.gmra.mxu1 %v3554_v32  ;;  %v2111_v58 = vsub.f32 %v2109_v55, %v2110_v54 }
  0x5c   : > { %2992 = vmatprep.mubr.f32.mxu0 %v1505_v40  ;;  %3016 = vmatprep.mubr.f32.mxu1 %v1503_v33 }
  0x5d   : > { %v2112_v61 = vand.u32 4294901760, %v2111_v58 }
  0x5f   : > { %2993 = vmatmul.mubr.f32.vlgmr.msra.gmra.mxu0 %v1515_v43  ;;  %3017 = vmatmul.mubr.f32.vlgmr.msra.gmra.mxu1 %v1513_v35 }
  0x60   : > { %3007 = vmatpush3.msra.mxu0 %v3405_v2  ;;  %2995 = vmatprep.mubr.f32.mxu0 %v1525_v45  ;;  %v2089_v2 = vsub.f32 %v3483_v49, %v3578_v47 }
  0x61   : > { %3022 = vmatprep.subr.mxu0 %v3414_v4  ;;  %3031 = vmatpush3.msra.mxu1 %v3399_v1  ;;  %v2099_v1 = vsub.f32 %v3492_v53, %v3584_v48  ;;  %v2119_v53 = vsub.f32 %v3505_v59, %v2118_v51 }
  0x62   : > { %3019 = vmatprep.mubr.f32.mxu1 %v1523_v38  ;;  %3046 = vmatprep.subr.mxu1 %v3473_v42  ;;  %v2090_v52 = vand.u32 4294901760, %v2089_v2 }
  0x63   : > { %2996 = vmatmul.mubr.f32.gmra.mxu0 %v1535_v46  ;;  %3020 = vmatmul.mubr.f32.gmra.mxu1 %v1533_v7  ;;  %v2100_v49 = vand.u32 4294901760, %v2099_v1 }
  0x64   : > { %3008 = vmatprep.mubr.f32.mxu0 %v1502_v28  ;;  %3032 = vmatprep.mubr.f32.mxu1 %v3537_v23 }
  0x65   : > { %v2101_v56 = vsub.f32 %v2099_v1, %v2100_v49 }
  0x67   : > { %3009 = vmatmul.mubr.f32.vlgmr.msra.gmra.mxu0 %v1512_v31  ;;  %3033 = vmatmul.mubr.f32.vlgmr.msra.gmra.mxu1 %v3545_v27  ;;  %v2102_v59 = vand.u32 4294901760, %v2101_v56 }
  0x68   : > { %3023 = vmatpush3.msra.mxu0 %v3414_v4  ;;  %3011 = vmatprep.mubr.f32.mxu0 %v1522_v34  ;;  %v2091_v4 = vsub.f32 %v2089_v2, %v2090_v52 }
  0x69   : > { %3038 = vmatprep.subr.mxu0 %v3419_v6  ;;  %3047 = vmatpush3.msra.mxu1 %v3473_v42  ;;  %v2120_v42 = vand.u32 4294901760, %v2119_v53 }
  0x6a   : > { %3035 = vmatprep.mubr.f32.mxu1 %v3549_v29  ;;  %3062 = vmatprep.subr.mxu1 %v3419_v6  ;;  %v2092_v57 = vand.u32 4294901760, %v2091_v4 }
  0x6b   : > { %3012 = vmatmul.mubr.f32.gmra.mxu0 %v1532_v36  ;;  %3036 = vmatmul.mubr.f32.gmra.mxu1 %v3554_v32  ;;  %v2121_v60 = vsub.f32 %v2119_v53, %v2120_v42 }
  0x6c   : > { %3024 = vmatprep.mubr.f32.mxu0 %v3537_v23  ;;  %3048 = vmatprep.mubr.f32.mxu1 %v3578_v47 }
  0x6d   : > { %v2122_v62 = vand.u32 4294901760, %v2121_v60 }
  0x6f   : > { %3025 = vmatmul.mubr.f32.vlgmr.msra.gmra.mxu0 %v3545_v27  ;;  %3049 = vmatmul.mubr.f32.vlgmr.msra.gmra.mxu1 %v3584_v48 }
  0x70   : > { %3039 = vmatpush3.msra.mxu0 %v3419_v6  ;;  %3027 = vmatprep.mubr.f32.mxu0 %v3549_v29 }
  0x71   : > { %3054 = vmatprep.subr.mxu0 %v3433_v11  ;;  %3063 = vmatpush3.msra.mxu1 %v3419_v6 }
  0x72   : > { %3051 = vmatprep.mubr.f32.mxu1 %v2108_v50  ;;  %3078 = vmatprep.subr.mxu1 %v3419_v6 }
  0x73   : > { %3028 = vmatmul.mubr.f32.gmra.mxu0 %v3554_v32  ;;  %3052 = vmatmul.mubr.f32.gmra.mxu1 %v2118_v51 }
  0x74   : > { %3040 = vmatprep.mubr.f32.mxu0 %v2092_v57  ;;  %3064 = vmatprep.mubr.f32.mxu1 %v2090_v52 }
  0x77   : > { %3041 = vmatmul.mubr.f32.vlgmr.msra.gmra.mxu0 %v2102_v59  ;;  %3065 = vmatmul.mubr.f32.vlgmr.msra.gmra.mxu1 %v2100_v49 }
  0x78   : > { %3055 = vmatpush3.msra.mxu0 %v3433_v11  ;;  %3043 = vmatprep.mubr.f32.mxu0 %v2112_v61 }
  0x79   : > { %3070 = vmatprep.subr.mxu0 %v3455_v24  ;;  %3079 = vmatpush3.msra.mxu1 %v3419_v6 }
  0x7a   : > { %3067 = vmatprep.mubr.f32.mxu1 %v2110_v54 }
  0x7b   : > { %3044 = vmatmul.mubr.f32.gmra.mxu0 %v2122_v62  ;;  %3068 = vmatmul.mubr.f32.gmra.mxu1 %v2120_v42 }
  0x7c   : > { %3056 = vmatprep.mubr.f32.mxu0 %v2089_v2  ;;  %3080 = vmatprep.mubr.f32.mxu1 %v3578_v47 }
  0x7f   : > { %3057 = vmatmul.mubr.f32.vlgmr.msra.gmra.mxu0 %v2099_v1  ;;  %3081 = vmatmul.mubr.f32.vlgmr.msra.gmra.mxu1 %v3584_v48 }
  0x80   : > { %3071 = vmatpush3.msra.mxu0 %v3455_v24  ;;  %3059 = vmatprep.mubr.f32.mxu0 %v2109_v55 }
  0x81   : > { %3083 = vmatprep.mubr.f32.mxu1 %v2108_v50 }
  0x83   : > { %3060 = vmatmul.mubr.f32.gmra.mxu0 %v2119_v53  ;;  %3084 = vmatmul.mubr.f32.gmra.mxu1 %v2118_v51 }
  0x84   : > { %3072 = vmatprep.mubr.f32.mxu0 %v3578_v47 }
  0x87   : > { %3073 = vmatmul.mubr.f32.vlgmr.msra.gmra.mxu0 %v3584_v48 }
  0x88   : > { %3075 = vmatprep.mubr.f32.mxu0 %v2108_v50 }
  0x8b   : > { %3076 = vmatmul.mubr.f32.gmra.mxu0 %v2118_v51 }
  0xe7   : > { %v2906_v6 = vpop.f32.mrf.mxu1 }
  0xe9   : > { %v422_v11 = vpop.f32.mrf.mxu1 }
  0xeb   : > { %v2909_v63 = vpop.f32.mrf.mxu1 }
  0xed   : > { %v434_v0 = vpop.f32.mrf.mxu1 }
  0xef   : > { %v2898_v3 = vpop.f32.mrf.mxu0  ;;  %v2922_v5 = vpop.f32.mrf.mxu1 }
  0xf0   : > { %v429_v23 = vadd.f32 %v2906_v6, %v2898_v3 }
  0xf1   : > { %v316_v8 = vpop.f32.mrf.mxu0  ;;  %v609_v9 = vpop.f32.mrf.mxu1 }
  0xf2   : > { %v423_v26 = vadd.f32 %v422_v11, %v316_v8 }
  0xf3   : > { %v2901_v10 = vpop.f32.mrf.mxu0  ;;  %v2925_v24 = vpop.f32.mrf.mxu1 }
  0xf4   : > { %v441_v30 = vadd.f32 %v2909_v63, %v2901_v10 }
  0xf5   : > { %v336_v12 = vpop.f32.mrf.mxu0  ;;  %v625_v13 = vpop.f32.mrf.mxu1 }
  0xf6   : > { %v435_v34 = vadd.f32 %v434_v0, %v336_v12 }
  0xf7   : > { %v2914_v14 = vpop.f32.mrf.mxu0  ;;  %v2938_v15 = vpop.f32.mrf.mxu1 }
  0xf8   : > { %v522_v27 = vadd.f32 %v2914_v14, %v429_v23 }
  0xf9   : > { %v514_v16 = vpop.f32.mrf.mxu0  ;;  %v797_v17 = vpop.f32.mrf.mxu1 }
  0xfa   : > { %v515_v31 = vadd.f32 %v514_v16, %v423_v26  ;;  %v618_v35 = vadd.f32 %v2922_v5, %v522_v27 }
  0xfb   : > { %v2917_v18 = vpop.f32.mrf.mxu0  ;;  %v2941_v19 = vpop.f32.mrf.mxu1 }
  0xfc   : > { %v536_v36 = vadd.f32 %v2917_v18, %v441_v30  ;;  %v610_v39 = vadd.f32 %v609_v9, %v515_v31 }
  0xfd   : > { %v528_v21 = vpop.f32.mrf.mxu0  ;;  %v809_v22 = vpop.f32.mrf.mxu1 }
  0xfe   : > { %v529_v7 = vadd.f32 %v528_v21, %v435_v34  ;;  %v634_v44 = vadd.f32 %v2925_v24, %v536_v36 }
  0xff   : > { %v2930_v20 = vpop.f32.mrf.mxu0  ;;  %v2954_v25 = vpop.f32.mrf.mxu1 }
 0x100   : > { %v714_v40 = vadd.f32 %v2930_v20, %v618_v35  ;;  %v626_v48 = vadd.f32 %v625_v13, %v529_v7 }
 0x101   : > { %v707_v28 = vpop.f32.mrf.mxu0  ;;  %v1009_v29 = vpop.f32.mrf.mxu1 }
 0x102   : > { %v708_v45 = vadd.f32 %v707_v28, %v610_v39  ;;  %v804_v2 = vadd.f32 %v2938_v15, %v714_v40 }
 0x103   : > { %v2933_v32 = vpop.f32.mrf.mxu0  ;;  %v2957_v33 = vpop.f32.mrf.mxu1 }
 0x104   : > { %v726_v50 = vadd.f32 %v2933_v32, %v634_v44  ;;  %v798_v52 = vadd.f32 %v797_v17, %v708_v45 }
 0x105   : > { %v719_v37 = vpop.f32.mrf.mxu0  ;;  %v1021_v38 = vpop.f32.mrf.mxu1 }
 0x106   : > { %v720_v55 = vadd.f32 %v719_v37, %v626_v48  ;;  %v816_v54 = vadd.f32 %v2941_v19, %v726_v50 }
 0x107   : > { %v2946_v41 = vpop.f32.mrf.mxu0  ;;  %v2970_v43 = vpop.f32.mrf.mxu1 }
 0x108   : > { %v914_v49 = vadd.f32 %v2946_v41, %v804_v2  ;;  %v810_v58 = vadd.f32 %v809_v22, %v720_v55 }
 0x109   : > { %v903_v46 = vpop.f32.mrf.mxu0  ;;  %v1196_v47 = vpop.f32.mrf.mxu1 }
 0x10a   : > { %v904_v56 = vadd.f32 %v903_v46, %v798_v52  ;;  %v1016_v59 = vadd.f32 %v2954_v25, %v914_v49 }
 0x10b   : > { %v2949_v1 = vpop.f32.mrf.mxu0  ;;  %v2973_v51 = vpop.f32.mrf.mxu1 }
 0x10c   : > { %v934_v60 = vadd.f32 %v2949_v1, %v816_v54  ;;  %v1010_v6 = vadd.f32 %v1009_v29, %v904_v56 }
 0x10d   : > { %v923_v53 = vpop.f32.mrf.mxu0  ;;  %v1212_v4 = vpop.f32.mrf.mxu1 }
 0x10e   : > { %v924_v11 = vadd.f32 %v923_v53, %v810_v58  ;;  %v1028_v5 = vadd.f32 %v2957_v33, %v934_v60 }
 0x10f   : > { %v2962_v42 = vpop.f32.mrf.mxu0  ;;  %v2986_v57 = vpop.f32.mrf.mxu1 }
 0x110   : > { %v1109_v63 = vadd.f32 %v2962_v42, %v1016_v59  ;;  %v1022_v24 = vadd.f32 %v1021_v38, %v924_v11 }
 0x111   : > { %v1101_v61 = vpop.f32.mrf.mxu0  ;;  %v1384_v62 = vpop.f32.mrf.mxu1 }
 0x112   : > { %v1102_v8 = vadd.f32 %v1101_v61, %v1010_v6  ;;  %v1205_v12 = vadd.f32 %v2970_v43, %v1109_v63 }
 0x113   : > { %v2965_v0 = vpop.f32.mrf.mxu0  ;;  %v2989_v3 = vpop.f32.mrf.mxu1 }
 0x114   : > { %v1123_v13 = vadd.f32 %v2965_v0, %v1028_v5  ;;  %v1197_v16 = vadd.f32 %v1196_v47, %v1102_v8 }
 0x115   : > { %v1115_v9 = vpop.f32.mrf.mxu0  ;;  %v1396_v10 = vpop.f32.mrf.mxu1 }
 0x116   : > { %v1116_v17 = vadd.f32 %v1115_v9, %v1022_v24  ;;  %v1221_v22 = vadd.f32 %v2973_v51, %v1123_v13 }
 0x117   : > { %v2978_v14 = vpop.f32.mrf.mxu0  ;;  %v3002_v15 = vpop.f32.mrf.mxu1 }
 0x118   : > { %v1301_v18 = vadd.f32 %v2978_v14, %v1205_v12  ;;  %v1213_v27 = vadd.f32 %v1212_v4, %v1116_v17 }
 0x119   : > { %v1294_v19 = vpop.f32.mrf.mxu0  ;;  %v1613_v21 = vpop.f32.mrf.mxu1 }
 0x11a   : > { %v1391_v23 = vadd.f32 %v2986_v57, %v1301_v18  ;;  %v1295_v20 = vadd.f32 %v1294_v19, %v1197_v16 }
 0x11b   : > { %v2981_v25 = vpop.f32.mrf.mxu0  ;;  %v3005_v26 = vpop.f32.mrf.mxu1 }
 0x11c   : > { %1408 = vst.msk [vmem:[%s3623_s19 + $0x8] sm:$0xff] %vm1406_vm1, %v1391_v23  ;;  %v1385_v28 = vadd.f32 %v1384_v62, %v1295_v20  ;;  %v1313_v29 = vadd.f32 %v2981_v25, %v1221_v22 }
 0x11d   : > { %v1306_v30 = vpop.f32.mrf.mxu0  ;;  %v1625_v31 = vpop.f32.mrf.mxu1 }
 0x11e   : > { %1407 = vst.msk [vmem:[%s3623_s19] sm:$0xff] %vm1406_vm1, %v1385_v28  ;;  %v1403_v32 = vadd.f32 %v2989_v3, %v1313_v29  ;;  %v1307_v33 = vadd.f32 %v1306_v30, %v1213_v27 }
 0x11f   : > { %v2994_v34 = vpop.f32.mrf.mxu0  ;;  %v3018_v35 = vpop.f32.mrf.mxu1 }
 0x120   : > { %1410 = vst.msk [vmem:[%s3623_s19 + $0x18] sm:$0xff] %vm1406_vm1, %v1403_v32  ;;  %v1397_v36 = vadd.f32 %v1396_v10, %v1307_v33  ;;  %v1620_v53 = vadd.f32 %v3002_v15, %v2994_v34 }
 0x121   : > { %v1507_v37 = vpop.f32.mrf.mxu0  ;;  %v1800_v38 = vpop.f32.mrf.mxu1 }
 0x122   : > { %1409 = vst.msk [vmem:[%s3623_s19 + $0x10] sm:$0xff] %vm1406_vm1, %v1397_v36  ;;  %v1614_v52 = vadd.f32 %v1613_v21, %v1507_v37 }
 0x123   : > { %v2997_v39 = vpop.f32.mrf.mxu0  ;;  %v3021_v7 = vpop.f32.mrf.mxu1 }
 0x124   : > { %v1632_v60 = vadd.f32 %v3005_v26, %v2997_v39 }
 0x125   : > { %v1527_v40 = vpop.f32.mrf.mxu0  ;;  %v1816_v41 = vpop.f32.mrf.mxu1 }
 0x126   : > { %v1626_v42 = vadd.f32 %v1625_v31, %v1527_v40 }
 0x127   : > { %v3010_v43 = vpop.f32.mrf.mxu0  ;;  %v3034_v44 = vpop.f32.mrf.mxu1 }
 0x128   : > { %v1713_v57 = vadd.f32 %v3010_v43, %v1620_v53 }
 0x129   : > { %v1705_v45 = vpop.f32.mrf.mxu0  ;;  %v1988_v46 = vpop.f32.mrf.mxu1 }
 0x12a   : > { %v1706_v4 = vadd.f32 %v1705_v45, %v1614_v52  ;;  %v1809_v63 = vadd.f32 %v3018_v35, %v1713_v57 }
 0x12b   : > { %v3013_v47 = vpop.f32.mrf.mxu0  ;;  %v3037_v48 = vpop.f32.mrf.mxu1 }
 0x12c   : > { %v1801_v61 = vadd.f32 %v1800_v38, %v1706_v4  ;;  %v1727_v0 = vadd.f32 %v3013_v47, %v1632_v60 }
 0x12d   : > { %v1719_v2 = vpop.f32.mrf.mxu0  ;;  %v2000_v50 = vpop.f32.mrf.mxu1 }
 0x12e   : > { %v1720_v62 = vadd.f32 %v1719_v2, %v1626_v42  ;;  %v1825_v13 = vadd.f32 %v3021_v7, %v1727_v0 }
 0x12f   : > { %v3026_v1 = vpop.f32.mrf.mxu0  ;;  %v3050_v51 = vpop.f32.mrf.mxu1 }
 0x130   : > { %v1817_v9 = vadd.f32 %v1816_v41, %v1720_v62  ;;  %v1905_v10 = vadd.f32 %v3026_v1, %v1809_v63 }
 0x131   : > { %v1898_v55 = vpop.f32.mrf.mxu0  ;;  %v2200_v49 = vpop.f32.mrf.mxu1 }
 0x132   : > { %v1899_v3 = vadd.f32 %v1898_v55, %v1801_v61  ;;  %v1995_v17 = vadd.f32 %v3034_v44, %v1905_v10 }
 0x133   : > { %v3029_v54 = vpop.f32.mrf.mxu0  ;;  %v3053_v56 = vpop.f32.mrf.mxu1 }
 0x134   : > { %v1989_v14 = vadd.f32 %v1988_v46, %v1899_v3  ;;  %v1917_v18 = vadd.f32 %v3029_v54, %v1825_v13 }
 0x135   : > { %v1910_v58 = vpop.f32.mrf.mxu0  ;;  %v2212_v59 = vpop.f32.mrf.mxu1 }
 0x136   : > { %v1911_v15 = vadd.f32 %v1910_v58, %v1817_v9  ;;  %v2007_v26 = vadd.f32 %v3037_v48, %v1917_v18 }
 0x137   : > { %v3042_v6 = vpop.f32.mrf.mxu0  ;;  %v3066_v11 = vpop.f32.mrf.mxu1 }
 0x138   : > { %v2001_v23 = vadd.f32 %v2000_v50, %v1911_v15  ;;  %v2105_v20 = vadd.f32 %v3042_v6, %v1995_v17 }
 0x139   : > { %v2094_v5 = vpop.f32.mrf.mxu0  ;;  %v2387_v8 = vpop.f32.mrf.mxu1 }
 0x13a   : > { %v2095_v19 = vadd.f32 %v2094_v5, %v1989_v14  ;;  %v2207_v31 = vadd.f32 %v3050_v51, %v2105_v20 }
 0x13b   : > { %v3045_v24 = vpop.f32.mrf.mxu0  ;;  %v3069_v12 = vpop.f32.mrf.mxu1 }
 0x13c   : > { %v2201_v27 = vadd.f32 %v2200_v49, %v2095_v19  ;;  %v2125_v32 = vadd.f32 %v3045_v24, %v2007_v26 }
 0x13d   : > { %v2114_v16 = vpop.f32.mrf.mxu0  ;;  %v2403_v22 = vpop.f32.mrf.mxu1 }
 0x13e   : > { %v2115_v28 = vadd.f32 %v2114_v16, %v2001_v23  ;;  %v2219_v39 = vadd.f32 %v3053_v56, %v2125_v32 }
 0x13f   : > { %v3058_v21 = vpop.f32.mrf.mxu0  ;;  %v3082_v30 = vpop.f32.mrf.mxu1 }
 0x140   : > { %v2213_v35 = vadd.f32 %v2212_v59, %v2115_v28  ;;  %v2300_v36 = vadd.f32 %v3058_v21, %v2207_v31 }
 0x141   : > { %v2292_v25 = vpop.f32.mrf.mxu0  ;;  %v2575_v38 = vpop.f32.mrf.mxu1 }
 0x142   : > { %v2293_v33 = vadd.f32 %v2292_v25, %v2201_v27  ;;  %v2396_v43 = vadd.f32 %v3066_v11, %v2300_v36 }
 0x143   : > { %v3061_v29 = vpop.f32.mrf.mxu0  ;;  %v3085_v47 = vpop.f32.mrf.mxu1 }
 0x144   : > { %v2388_v7 = vadd.f32 %v2387_v8, %v2293_v33  ;;  %v2314_v44 = vadd.f32 %v3061_v29, %v2219_v39 }
 0x145   : > { %v2306_v34 = vpop.f32.mrf.mxu0  ;;  %v2587_v55 = vpop.f32.mrf.mxu1 }
 0x146   : > { %v2307_v40 = vadd.f32 %v2306_v34, %v2213_v35  ;;  %v2412_v51 = vadd.f32 %v3069_v12, %v2314_v44 }
 0x147   : > { %v3074_v37 = vpop.f32.mrf.mxu0 }
 0x148   : > { %v2404_v48 = vadd.f32 %v2403_v22, %v2307_v40  ;;  %v2492_v2 = vadd.f32 %v3074_v37, %v2396_v43 }
 0x149   : > { %v2485_v41 = vpop.f32.mrf.mxu0 }
 0x14a   : > { %v2486_v45 = vadd.f32 %v2485_v41, %v2388_v7  ;;  %v2582_v49 = vadd.f32 %v3082_v30, %v2492_v2 }
 0x14b   : > { %v3077_v46 = vpop.f32.mrf.mxu0 }
 0x14c   : > { %v2576_v50 = vadd.f32 %v2575_v38, %v2486_v45  ;;  %v2504_v53 = vadd.f32 %v3077_v46, %v2412_v51 }
 0x14d   : > { %v2497_v1 = vpop.f32.mrf.mxu0 }
 0x14e   : > { %v2498_v52 = vadd.f32 %v2497_v1, %v2404_v48  ;;  %2601 = vrot.lane.b32.xlu0 %v2576_v50, %s3287_s27  ;;  %v2594_v54 = vadd.f32 %v3085_v47, %v2504_v53 }
 0x150   : > { %v2588_v4 = vadd.f32 %v2587_v55, %v2498_v52 }
 0x152   : > { %2603 = vrot.lane.b32.xlu0 %v2582_v49, %s3287_s27  ;;  %2605 = vrot.lane.b32.xlu1 %v2588_v4, %s3287_s27 }
 0x156   : > { %2607 = vrot.lane.b32.xlu1 %v2594_v54, %s3287_s27  ;;  %s3181_s27 = sshll.u32 %s3288_s14, 4  ;;  %s3182_s27 = int_to_ptr.vmem [resolvable:$false] %s3181_s27 }
 0x157   : > { %s3183_s28 = scalar_lea.vmem %s3182_s27, 1024  ;;  %p3184_p6 = scmp.lt.s32.totalorder %s3645_s6, %s3182_s27 }
 0x158   : > { %p3185_p8 = scmp.lt.s32.totalorder %s3183_s28, %s3177_s13 }
 0x15a   : > { %p3186_p9 = por %p3185_p8, %p3184_p6 }
 0x15c   : > { %p3187_p10 = pnand %p3186_p9, %p3180_p4 }
 0x1c0   : > { %v2602_v56 = vpop.permute.xlu0 %2601 }
 0x1c1   : > { %2614 = vst.msk [vmem:[%s3623_s19] sm:$0xff] %vm2613_vm2, %v2602_v56 }
 0x1c4   : > { %v2604_v42 = vpop.permute.xlu0 %2603  ;;  %v2606_v57 = vpop.permute.xlu1 %2605 }
 0x1c5   : > { %2615 = vst.msk [vmem:[%s3623_s19 + $0x8] sm:$0xff] %vm2613_vm2, %v2604_v42  ;;  %2616 = vst.msk [vmem:[%s3623_s19 + $0x10] sm:$0xff] %vm2613_vm2, %v2606_v57 }
 0x1c8   : > { %v2608_v58 = vpop.permute.xlu1 %2607 }
 0x1c9   : > { %2617 = vst.msk [vmem:[%s3623_s19 + $0x18] sm:$0xff] %vm2613_vm2, %v2608_v58 }
 0x1ca   : > { %3190 = shalt.err (!%p3187_p10)
}
 0x1cb   : > { %s3191_s7 = scalar_lea.hbm %s3643_s8, 512  ;;  %s3195_s30 = scalar_lea.hbm %s3709_s2, 4096 }
 0x1cc   : > { %p3192_p11 = scmp.ne.s32.totalorder %s3643_s8, %s3191_s7  ;;  %p3196_p0 = scmp.lt.s32.totalorder %s3643_s8, %s3709_s2 }
 0x1cd   : > { %p3197_p1 = scmp.lt.s32.totalorder %s3195_s30, %s3191_s7 }
 0x1ce   : > { %p3193_p12 = pnand %p3192_p11, %p3369_p5 }
 0x1cf   : > { %p3198_p2 = por %p3197_p1, %p3196_p0 }
 0x1d0   : > { %p3194_p13 = pneg %p3193_p12 }
 0x1d2   : > { %p3199_p3 = pnand %p3198_p2, %p3194_p13 }
 0x1d4   : > { %3202 = shalt.err (!%p3199_p3)
}
 0x1d5   : > { %s3289_s22 = smov 128   ;;  %s3290_s26 = smov 256  }
 0x1d6   : > { %s3291_s13 = smov 8  }
 0x1d7   : > { %3086 = dma.vmem_to_hbm [thread:$0]  (%p3369_p5), %s3645_s6, 512, %s3643_s8, %s3650_s12, %s3289_s22, %s3290_s26, %s3291_s13  }
 0x1d8 PF: > { %p3092_p4 = scmp.ge.s32.totalorder %s3285_s18, 2  ;;  %s2653_s14 = sand.u32 1, %s3249_s9  }
 0x1d9   : > { %s2654_s27 = scalar_lea.sflag [#allocation3], %s2653_s14 }
 0x1da   : > { %p3089_p6 = pnand %p3092_p4, %p3376_p7 }
 0x1dc   : > { %p3090_p8 = pneg %p3089_p6 }
 0x1de   : > { %3244 = dma.done.wait (%p3090_p8), %s2654_s27, 512  }
 0x1df   : > { %3246 = vsyncadd (%p3090_p8), %s2654_s27, 4294966784  ;;  %s15_s18 = sadd.s32 1, %s3285_s18   ;;  %s3712_s9 = smov %s3253_s10 }
 0x1e0   : > { %p12_p9 = scmp.ge.s32.totalorder %s15_s18, 10   ;;  %s3713_s10 = smov %s3257_s11 }
 0x1e1   : > { %s3714_s11 = smov %s3392_s4  ;;  %s3715_s12 = smov %s3273_s15 }
 0x1e2   : > { %s3716_s13 = smov %s3277_s16  ;;  %s3717_s14 = smov %s3281_s17 }
 0x1e3   : > { %s3718_s15 = smov %s3722_s20  ;;  %s3719_s16 = smov %s3726_s21 }
 0x1e4   : > { %s3720_s17 = smov %s3730_s23  ;;  %14 = sbr.rel (!%p12_p9) target bundleno = 6 (0x6), region = 67 }
 0x1e9   :  { %2659 = vsyncpa [#allocation3], 1 }
 0x1ea   :  { %2661 = vsyncpa [#allocation3 + $0x1], 1 }

// kernel: tpu_custom_call.1
= control target key start
LH: loop header
LB: loop body
LE: loop exit
PB: predicated region body
PF: predicated region fallthrough
CT: control target
= control target key end

     0   :  { %7 = vsyncpa [#allocation3], 0  ;;  %s1326_s0 = inlined_call_operand.vmem [shape: f32[2,2,2,4,32,8], index: 0, kind: input, shape index: {}]   ;;  %s1327_s1 = inlined_call_operand.vmem [shape: f32[2,8,16], index: 1, kind: input, shape index: {}]   ;;  %s1328_s2 = inlined_call_operand.hbm [shape: f32[2,2,4,2,8,32], index: 2, kind: output, shape index: {}]  }
   0x1   :  { %9 = vsyncpa [#allocation3 + $0x1], 0  ;;  %s1103_s9 = smov 0   ;;  %s1105_s10 = smov 0  }
   0x2   :  { %s1107_s11 = smov 0   ;;  %s1109_s12 = smov 0  }
   0x3   :  { %s1111_s13 = smov 0   ;;  %s1113_s14 = smov 0  }
   0x4   :  { %s1115_s15 = smov 0   ;;  %s1117_s16 = smov 0  }
   0x5   :  { %s1119_s17 = smov 0   ;;  %s1121_s18 = smov 0  }
   0x6 LB: > { %s784_s19 = sadd.s32 4294967295, %s1081_s18   ;;  %s33_s20 = sadd.s32 1, %s1069_s15  ;;  %s1081_s18 = sphi %s1121_s18, %s15_s18   ;;  %s1077_s17 = sphi %s1119_s17, %s1339_s17   ;;  %s1073_s16 = sphi %s1117_s16, %s1338_s16   ;;  %s1069_s15 = sphi %s1115_s15, %s1337_s15   ;;  %s1065_s14 = sphi %s1113_s14, %s1336_s14   ;;  %s1061_s13 = sphi %s1111_s13, %s1335_s13   ;;  %s1057_s12 = sphi %s1109_s12, %s1334_s12   ;;  %s1053_s11 = sphi %s1107_s11, %s1333_s11   ;;  %s1049_s10 = sphi %s1105_s10, %s1332_s10   ;;  %s1045_s9 = sphi %s1103_s9, %s1331_s9  }
   0x7   : > { %p35_p0 = scmp.ge.s32.totalorder %s33_s20, 2  ;;  %s37_s21 = sadd.s32 1, %s1073_s16 }
   0x8   : > { %s785_s22 = sadd.s32 4294967294, %s1081_s18   ;;  %p117_p1 = scmp.ne.s32.totalorder %s1053_s11, %s1049_s10 }
   0x9   : > { %s1341_s20 = smov (%p35_p0, %s33_s20), 0  ;;  %s1343_s21 = smov (!%p35_p0, %s37_s21), %s1073_s16 }
   0xa   : > { %s41_s23 = sadd.s32 1, %s1077_s17  ;;  %p118_p2 = scmp.eq.s32.totalorder %s784_s19, 7 }
   0xb   : > { %p39_p3 = scmp.ge.s32.totalorder %s1343_s21, 2  ;;  %p123_p4 = scmp.ne.s32.totalorder %s1049_s10, %s1045_s9 }
   0xc   : > { %p1165_p5 = por %p118_p2, %p117_p1  ;;  %p124_p6 = scmp.eq.s32.totalorder %s785_s22, 7 }
   0xd   : > { %s1345_s21 = smov (%p39_p3, %s1343_s21), 0  ;;  %s1347_s23 = smov (!%p39_p3, %s41_s23), %s1077_s17 }
   0xe   : > { %p1172_p7 = por %p124_p6, %p123_p4  ;;  %p43_p8 = scmp.ge.s32.totalorder %s1347_s23, 2 }
   0xf   : > { %p788_p9 = scmp.ge.s32.totalorder %s1081_s18, 1  ;;  %s99_s26 = ssub.s32 %s1073_s16, %s1345_s21 }
  0x10   : > { %p166_p10 = scmp.lt.s32.totalorder %s1081_s18, 9  ;;  %s1349_s23 = smov (%p43_p8, %s1347_s23), 0 }
  0x11   : > { %s103_s27 = ssub.s32 %s1069_s15, %s1341_s20  ;;  %s98_s28 = ssub.s32 %s1077_s17, %s1349_s23 }
  0x12   : > { %p167_p11 = pnand %p788_p9, %p166_p10  ;;  %s100_s29 = sor.u32 %s99_s26, %s98_s28 }
  0x13   : > { %s104_s30 = sor.u32 %s103_s27, %s100_s29  ;;  %s107_s3 = sadd.s32 1, %s1053_s11 }
  0x14   : > { %p105_p12 = scmp.eq.s32.totalorder %s104_s30, 0  ;;  %170 = sbr.rel (%p167_p11) target bundleno = 380 (0x17c), region = 28 }
  0x15   : > { %p201_p13 = scmp.lt.s32.totalorder (!%p167_p11), %s1065_s14, 1  ;;  %p203_p0 = scmp.lt.s32.totalorder (!%p167_p11), %s1061_s13, 1 }
  0x16   : > { %s1188_s4 = scalar_select %p105_p12, %s1053_s11, %s107_s3  }
  0x17   : > { %p205_p1 = scmp.lt.s32.totalorder (!%p167_p11), %s1057_s12, 1 }
  0x19   : > { %v798_v0 = vld [vmem:[%s1327_s1 + $0x8] sm:$0xff]  ;;  %v223_v1 = vld [vmem:[%s1327_s1] sm:$0xff]  ;;  %s202_s19 = scalar_select %p201_p13, %s1065_s14, 1  ;;  %vm231_vm0 = vcmask 64512   ;;  %vm426_vm1 = vcmask 130048   ;;  %vm653_vm2 = vcmask 261248  }
  0x1a   : > { %850 = vmatprep.subr.mxu0 %v798_v0  ;;  %858 = vmatprep.subr.mxu1 %v223_v1  ;;  %s204_s22 = scalar_select %p203_p0, %s1061_s13, 1 }
  0x1b   : > { %851 = vmatpush3.msra.mxu0 %v798_v0  ;;  %859 = vmatpush3.msra.mxu1 %v223_v1  ;;  %s206_s26 = scalar_select %p205_p1, %s1057_s12, 1 }
  0x1c   : > { %866 = vmatprep.subr.mxu0 %v798_v0  ;;  %874 = vmatprep.subr.mxu1 %v223_v1  ;;  %s791_s27 = sshll.u32 %s204_s22, 5  ;;  %s792_s28 = sshll.u32 %s202_s19, 6 }
  0x1d   : > { %s790_s29 = sshll.u32 %s206_s26, 4  ;;  %s197_s19 = sand.u32 1, %s1049_s10  }
  0x1e   : > { %s212_s30 = sadd.s32 %s791_s27, %s790_s29  ;;  %s789_s22 = sshll.u32 %s197_s19, 5 }
  0x1f   : > { %s214_s3 = sadd.s32 %s792_s28, %s212_s30  ;;  %s1242_s26 = scalar_lea.vmem [#allocation2], %s789_s22 }
  0x20   : > { %s793_s5 = sshll.u32 %s214_s3, 3  ;;  %s1083_s27 = smov 16  }
  0x21   : > { %s1205_s8 = scalar_lea.vmem %s1326_s0, %s793_s5  ;;  %s825_s28 = sshll.u32 %s1061_s13, 3 }
  0x22   : > { %v794_v2 = vld [vmem:[%s1205_s8 + $0x20] sm:$0xff]  ;;  %v795_v4 = vld [vmem:[%s1205_s8 + $0x28] sm:$0xff]  ;;  %v796_v6 = vld [vmem:[%s1205_s8 + $0x30] sm:$0xff]  ;;  %s673_s29 = sadd.s32 %s1057_s12, %s825_s28  ;;  %s826_s30 = sshll.u32 %s1065_s14, 4 }
  0x23   : > { %v219_v3 = vld [vmem:[%s1205_s8] sm:$0xff]  ;;  %852 = vmatprep.mubr.msk.f32.mxu0 %vm231_vm0, %v794_v2  ;;  %v220_v5 = vld [vmem:[%s1205_s8 + $0x8] sm:$0xff]  ;;  %v221_v7 = vld [vmem:[%s1205_s8 + $0x10] sm:$0xff]  ;;  %s675_s3 = sadd.s32 %s826_s30, %s673_s29  ;;  %s678_s6 = sshll.u32 %s1242_s26, 4  ;;  %s1264_s6 = int_to_ptr.vmem [resolvable:$true] %s678_s6 }
  0x24   : > { %860 = vmatprep.mubr.msk.f32.mxu1 %vm231_vm0, %v219_v3  ;;  %853 = vmatmul.mubr.msk.f32.vlgmr.msra.gmra.mxu0 %vm231_vm0, %v795_v4  ;;  %v797_v8 = vld [vmem:[%s1205_s8 + $0x38] sm:$0xff]  ;;  %v811_v10 = vld [vmem:[%s1205_s8 + $0x60] sm:$0xff]  ;;  %v812_v12 = vld [vmem:[%s1205_s8 + $0x68] sm:$0xff]  ;;  %s827_s5 = sshll.u32 %s675_s3, 7  ;;  %s1269_s12 = scalar_lea.sflag [#allocation3], %s197_s19 }
  0x25   : > { %861 = vmatmul.mubr.msk.f32.vlgmr.msra.gmra.mxu1 %vm231_vm0, %v220_v5  ;;  %867 = vmatpush3.msra.mxu0 %v798_v0  ;;  %v222_v9 = vld [vmem:[%s1205_s8 + $0x18] sm:$0xff]  ;;  %v807_v11 = vld [vmem:[%s1205_s8 + $0x40] sm:$0xff]  ;;  %v808_v13 = vld [vmem:[%s1205_s8 + $0x48] sm:$0xff]  ;;  %s1262_s22 = scalar_lea.hbm %s1328_s2, %s827_s5  ;;  %s973_s13 = scalar_lea.vmem %s1264_s6, 512 }
  0x26   : > { %875 = vmatpush3.msra.mxu1 %v223_v1  ;;  %855 = vmatprep.mubr.msk.f32.mxu0 %vm231_vm0, %v796_v6  ;;  %v813_v14 = vld [vmem:[%s1205_s8 + $0x70] sm:$0xff]  ;;  %v814_v16 = vld [vmem:[%s1205_s8 + $0x78] sm:$0xff]  ;;  %p974_p2 = scmp.ne.s32.totalorder %s1264_s6, %s973_s13  ;;  %s1084_s14 = smov [#allocation2]  }
  0x27   : > { %863 = vmatprep.mubr.msk.f32.mxu1 %vm231_vm0, %v221_v7  ;;  %v809_v15 = vld [vmem:[%s1205_s8 + $0x50] sm:$0xff]  ;;  %v810_v17 = vld [vmem:[%s1205_s8 + $0x58] sm:$0xff] }
  0x28   : > { %856 = vmatmul.mubr.msk.f32.gmra.mxu0 %vm231_vm0, %v797_v8  ;;  %p975_p3 = pnand %p974_p2, %p1165_p5 }
  0x29   : > { %864 = vmatmul.mubr.msk.f32.gmra.mxu1 %vm231_vm0, %v222_v9  ;;  %868 = vmatprep.mubr.msk.f32.mxu0 %vm231_vm0, %v811_v10 }
  0x2a   : > { %876 = vmatprep.mubr.msk.f32.mxu1 %vm231_vm0, %v807_v11  ;;  %p976_p4 = pneg %p975_p3 }
  0x2c   : > { %869 = vmatmul.mubr.msk.f32.vlgmr.msra.gmra.mxu0 %vm231_vm0, %v812_v12 }
  0x2d   : > { %877 = vmatmul.mubr.msk.f32.vlgmr.msra.gmra.mxu1 %vm231_vm0, %v808_v13  ;;  %871 = vmatprep.mubr.msk.f32.mxu0 %vm231_vm0, %v813_v14 }
  0x2e   : > { %879 = vmatprep.mubr.msk.f32.mxu1 %vm231_vm0, %v809_v15 }
  0x30   : > { %872 = vmatmul.mubr.msk.f32.gmra.mxu0 %vm231_vm0, %v814_v16 }
  0x31   : > { %880 = vmatmul.mubr.msk.f32.gmra.mxu1 %vm231_vm0, %v810_v17 }
  0xe4   : > { %v854_v18 = vpop.f32.mrf.mxu0 }
  0xe5   : > { %v862_v19 = vpop.f32.mrf.mxu1 }
  0xe6   : > { %v413_v20 = vadd.f32 %v862_v19, %v854_v18  ;;  %v310_v21 = vpop.f32.mrf.mxu0 }
  0xe7   : > { %v407_v22 = vpop.f32.mrf.mxu1 }
  0xe8   : > { %428 = vst.msk [vmem:[%s1242_s26 + $0x8] sm:$0xff] %vm426_vm1, %v413_v20  ;;  %v408_v23 = vadd.f32 %v407_v22, %v310_v21  ;;  %v857_v24 = vpop.f32.mrf.mxu0 }
  0xe9   : > { %v865_v25 = vpop.f32.mrf.mxu1 }
  0xea   : > { %427 = vst.msk [vmem:[%s1242_s26] sm:$0xff] %vm426_vm1, %v408_v23  ;;  %v423_v26 = vadd.f32 %v865_v25, %v857_v24  ;;  %v320_v27 = vpop.f32.mrf.mxu0 }
  0xeb   : > { %v417_v28 = vpop.f32.mrf.mxu1 }
  0xec   : > { %430 = vst.msk [vmem:[%s1242_s26 + $0x18] sm:$0xff] %vm426_vm1, %v423_v26  ;;  %v418_v29 = vadd.f32 %v417_v28, %v320_v27  ;;  %v870_v30 = vpop.f32.mrf.mxu0 }
  0xed   : > { %v878_v31 = vpop.f32.mrf.mxu1 }
  0xee   : > { %429 = vst.msk [vmem:[%s1242_s26 + $0x10] sm:$0xff] %vm426_vm1, %v418_v29  ;;  %v521_v32 = vpop.f32.mrf.mxu0  ;;  %v624_v39 = vadd.f32 %v878_v31, %v870_v30 }
  0xef   : > { %v618_v33 = vpop.f32.mrf.mxu1 }
  0xf0   : > { %v619_v34 = vadd.f32 %v618_v33, %v521_v32  ;;  %v873_v35 = vpop.f32.mrf.mxu0 }
  0xf1   : > { %v881_v36 = vpop.f32.mrf.mxu1 }
  0xf2   : > { %641 = vrot.lane.b32.xlu0 %v619_v34, %s1083_s27  ;;  %v531_v37 = vpop.f32.mrf.mxu0  ;;  %v634_v41 = vadd.f32 %v881_v36, %v873_v35 }
  0xf3   : > { %v628_v38 = vpop.f32.mrf.mxu1 }
  0xf4   : > { %v629_v40 = vadd.f32 %v628_v38, %v531_v37 }
  0xf6   : > { %645 = vrot.lane.b32.xlu1 %v629_v40, %s1083_s27  ;;  %643 = vrot.lane.b32.xlu0 %v624_v39, %s1083_s27 }
  0xfa   : > { %647 = vrot.lane.b32.xlu1 %v634_v41, %s1083_s27  ;;  %s977_s27 = sshll.u32 %s1084_s14, 4  ;;  %s978_s27 = int_to_ptr.vmem [resolvable:$false] %s977_s27 }
  0xfb   : > { %s979_s28 = scalar_lea.vmem %s978_s27, 1024  ;;  %p980_p6 = scmp.lt.s32.totalorder %s1264_s6, %s978_s27 }
  0xfc   : > { %p981_p8 = scmp.lt.s32.totalorder %s979_s28, %s973_s13 }
  0xfe   : > { %p982_p9 = por %p981_p8, %p980_p6 }
 0x100   : > { %p983_p10 = pnand %p982_p9, %p976_p4 }
 0x164   : > { %v642_v42 = vpop.permute.xlu0 %641 }
 0x165   : > { %654 = vst.msk [vmem:[%s1242_s26] sm:$0xff] %vm653_vm2, %v642_v42 }
 0x168   : > { %v646_v43 = vpop.permute.xlu1 %645  ;;  %v644_v44 = vpop.permute.xlu0 %643 }
 0x169   : > { %656 = vst.msk [vmem:[%s1242_s26 + $0x10] sm:$0xff] %vm653_vm2, %v646_v43  ;;  %655 = vst.msk [vmem:[%s1242_s26 + $0x8] sm:$0xff] %vm653_vm2, %v644_v44 }
 0x16c   : > { %v648_v45 = vpop.permute.xlu1 %647 }
 0x16d   : > { %657 = vst.msk [vmem:[%s1242_s26 + $0x18] sm:$0xff] %vm653_vm2, %v648_v45 }
 0x16e   : > { %986 = shalt.err (!%p983_p10)
}
 0x16f   : > { %s987_s19 = scalar_lea.hbm %s1262_s22, 512  ;;  %s991_s30 = scalar_lea.hbm %s1328_s2, 4096 }
 0x170   : > { %p988_p11 = scmp.ne.s32.totalorder %s1262_s22, %s987_s19  ;;  %p992_p0 = scmp.lt.s32.totalorder %s1262_s22, %s1328_s2 }
 0x171   : > { %p993_p1 = scmp.lt.s32.totalorder %s991_s30, %s987_s19 }
 0x172   : > { %p989_p12 = pnand %p988_p11, %p1165_p5 }
 0x173   : > { %p994_p2 = por %p993_p1, %p992_p0 }
 0x174   : > { %p990_p13 = pneg %p989_p12 }
 0x176   : > { %p995_p3 = pnand %p994_p2, %p990_p13 }
 0x178   : > { %998 = shalt.err (!%p995_p3)
}
 0x179   : > { %s1085_s7 = smov 128   ;;  %s1086_s8 = smov 256  }
 0x17a   : > { %s1087_s13 = smov 8  }
 0x17b   : > { %882 = dma.vmem_to_hbm [thread:$0]  (%p1165_p5), %s1264_s6, 512, %s1262_s22, %s1269_s12, %s1085_s7, %s1086_s8, %s1087_s13  }
 0x17c PF: > { %p888_p4 = scmp.ge.s32.totalorder %s1081_s18, 2  ;;  %s693_s14 = sand.u32 1, %s1045_s9  }
 0x17d   : > { %s694_s27 = scalar_lea.sflag [#allocation3], %s693_s14 }
 0x17e   : > { %p885_p6 = pnand %p888_p4, %p1172_p7 }
 0x180   : > { %p886_p8 = pneg %p885_p6 }
 0x182   : > { %1040 = dma.done.wait (%p886_p8), %s694_s27, 512  }
 0x183   : > { %1042 = vsyncadd (%p886_p8), %s694_s27, 4294966784  ;;  %s15_s18 = sadd.s32 1, %s1081_s18   ;;  %s1331_s9 = smov %s1049_s10 }
 0x184   : > { %p12_p9 = scmp.ge.s32.totalorder %s15_s18, 10   ;;  %s1332_s10 = smov %s1053_s11 }
 0x185   : > { %s1333_s11 = smov %s1188_s4  ;;  %s1334_s12 = smov %s1069_s15 }
 0x186   : > { %s1335_s13 = smov %s1073_s16  ;;  %s1336_s14 = smov %s1077_s17 }
 0x187   : > { %s1337_s15 = smov %s1341_s20  ;;  %s1338_s16 = smov %s1345_s21 }
 0x188   : > { %s1339_s17 = smov %s1349_s23  ;;  %14 = sbr.rel (!%p12_p9) target bundleno = 6 (0x6), region = 67 }
 0x18d   :  { %699 = vsyncpa [#allocation3], 1 }
 0x18e   :  { %701 = vsyncpa [#allocation3 + $0x1], 1 }

</bundles_post_ra>
